<compile_context>
chip_gen: v6e
topology: v6e:2x2x1
jax: 0.10.0
libtpu: 0.0.40
codegen_flags: <defaults>
</compile_context>

<pallas_src>
import functools

import jax
import jax.numpy as jnp
from jax.experimental import pallas as pl
from jax.experimental.pallas import tpu as pltpu


def prehighway_highway_kernel(p_ref, r_ref, wp_ref, w_ref, b_ref, o_ref, *,
                              n_layers, d):
    """One row-tile: pre_highway matmul + residual add + highway recurrence."""
    wp = wp_ref[...]                                  # (D, D)   pre_highway
    w = w_ref[...]                                    # (D, 2D)  fused [W_H|W_T]
    b = b_ref[...].astype(jnp.float32)                # (1, 2D)  broadcast in add

    # x = proj @ W_pre + residual   (pre_highway has no bias)
    x = jnp.dot(p_ref[...].astype(wp.dtype), wp,
                preferred_element_type=jnp.float32) + r_ref[...].astype(jnp.float32)

    def body(_, x):
        # Single fused MXU matmul: y = [x @ W_H | x @ W_T] + [b_H | b_T]
        y = jnp.dot(x.astype(w.dtype), w,
                    preferred_element_type=jnp.float32) + b
        h = jnp.maximum(y[:, :d], 0.0)                # ReLU            (VPU)
        t = 0.5 * jnp.tanh(0.5 * y[:, d:]) + 0.5      # sigmoid via tanh (EUP)
        return x + t * (h - x)                        # == h*t + x*(1-t)

    x = jax.lax.fori_loop(0, n_layers, body, x, unroll=(n_layers <= 8))
    o_ref[...] = x.astype(o_ref.dtype)


def _num_tensorcores():
    """Best-effort TensorCore count (v7x has 2 per chip; v5e/v6e have 1)."""
    try:
        info = pltpu.get_tpu_info()
    except Exception:
        return 1
    for attr in ("num_cores", "core_count", "tensorcore_count", "num_tensorcores"):
        n = getattr(info, attr, None)
        if isinstance(n, int) and n > 0:
            return n
    return 1


def _pick_tile_m(rows, n_cores):
    """Row-tile size: single step on single-TC chips, capped at 256 rows."""
    CAP = 256  # beyond this the unrolled x/y/h/t live set spills the vreg file
    if n_cores >= 2:
        # Dual-TC: split only if each "parallel" step keeps a >=128-row tile.
        for t in (256, 128):
            if t <= rows // 2 and rows % t == 0:
                return t
    if rows <= CAP and rows % 8 == 0:
        return rows                       # one grid step over the whole batch
    for t in (256, 128, 64, 32, 16, 8):
        if rows % t == 0:
            return t
    # Ragged row count: single full-extent block.
    # TODO(synk): pad (batch*time) upstream for ragged sizes instead.
    return rows


def prepare_params(w_pre, w_h, b_h, w_t, b_t, weight_dtype=jnp.float32):
    """One-time parameter prep (hoisted out of the per-forward path).

    All weights are stored pre-transposed as (in_features, out_features).
    Returns (w_pre, w_fused(D,2D), b_fused(1,2D)).
    """
    d = w_h.shape[0]
    assert w_h.shape == (d, d) and w_t.shape == (d, d) and w_pre.shape == (d, d)
    w_fused = jnp.concatenate([w_h, w_t], axis=1).astype(weight_dtype)
    b_fused = jnp.concatenate([b_h, b_t]).reshape(1, 2 * d).astype(jnp.float32)
    return w_pre.astype(weight_dtype), w_fused, b_fused


def prehighway_highway_forward(proj, residual, w_pre, w_fused, b_fused, *,
                               n_layers=4, tile_m=None):
    """Fused CBHG tail: pre_highway(proj) + residual, then the highway net.

    proj, residual: (..., D).  w_pre: (D, D).  w_fused: (D, 2D).  b_fused: (1, 2D).
    """
    orig_shape = proj.shape
    D = orig_shape[-1]
    assert residual.shape == orig_shape
    assert w_pre.shape == (D, D) and w_fused.shape == (D, 2 * D)
    assert b_fused.shape == (1, 2 * D)

    p2 = proj.reshape(-1, D)
    r2 = residual.reshape(-1, D)
    rows = p2.shape[0]

    if tile_m is None:
        tile_m = _pick_tile_m(rows, _num_tensorcores())
    assert rows % tile_m == 0, "rows must be a multiple of the row tile"

    kernel = functools.partial(prehighway_highway_kernel, n_layers=n_layers, d=D)

    itemsize = jnp.dtype(proj.dtype).itemsize
    w_bytes = (int(w_pre.size) + int(w_fused.size)) * jnp.dtype(w_fused.dtype).itemsize
    cost = pl.CostEstimate(
        flops=(2 * rows * D * D                      # pre_highway matmul
               + 2 * n_layers * rows * D * (2 * D)   # highway matmuls
               + 6 * n_layers * rows * D),           # blend / relu / bias
        transcendentals=n_layers * rows * D,         # tanh per element/layer
        bytes_accessed=(3 * rows * D * itemsize      # proj + residual + out
                        + w_bytes + int(b_fused.size) * 4),
    )

    out = pl.pallas_call(
        kernel,
        out_shape=jax.ShapeDtypeStruct((rows, D), proj.dtype),
        grid_spec=pltpu.PrefetchScalarGridSpec(
            num_scalar_prefetch=0,
            grid=(rows // tile_m,),
            in_specs=[
                pl.BlockSpec((tile_m, D), lambda i: (i, 0)),     # proj tile
                pl.BlockSpec((tile_m, D), lambda i: (i, 0)),     # residual tile
                pl.BlockSpec((D, D), lambda i: (0, 0)),          # pre_highway W
                pl.BlockSpec((D, 2 * D), lambda i: (0, 0)),      # fused [W_H|W_T]
                pl.BlockSpec((1, 2 * D), lambda i: (0, 0)),      # fused bias
            ],
            out_specs=pl.BlockSpec((tile_m, D), lambda i: (i, 0)),
        ),
        compiler_params=pltpu.CompilerParams(
            dimension_semantics=("parallel",),
        ),
        cost_estimate=cost,
    )(p2, r2, w_pre, w_fused, b_fused)
    return out.reshape(orig_shape)


def reference_f32(proj, resid, w_pre, w_h, b_h, w_t, b_t, n_layers=4):
    """Pure-f32 reference mirroring the PyTorch forward exactly."""
    d = proj.shape[-1]
    x = proj.reshape(-1, d).astype(jnp.float32) @ w_pre \
        + resid.reshape(-1, d).astype(jnp.float32)
    for _ in range(n_layers):
        h = jnp.maximum(x @ w_h + b_h, 0.0)
        t = jax.nn.sigmoid(x @ w_t + b_t)
        x = h * t + x * (1.0 - t)
    return x.reshape(proj.shape)


if __name__ == "__main__":
    key = jax.random.PRNGKey(0)
    k_p, k_r, k_wp, k_wh, k_wt = jax.random.split(key, 5)

    # Highway input inside the Encoder's CBHG: (batch, time, 128)
    BATCH, SEQ, D = 2, 64, 128
    N_LAYERS = 4

    # proj: output of conv1d_proj_2 (after transpose), feeds pre_highway.
    proj = jax.random.normal(k_p, (BATCH, SEQ, D), dtype=jnp.float32)
    # residual: prenet output ("inputs" in CBHG.forward), added after pre_highway.
    resid = jax.random.normal(k_r, (BATCH, SEQ, D), dtype=jnp.float32)

    # PyTorch nn.Linear default init ~ U(-1/sqrt(in), 1/sqrt(in)); weights
    # stored pre-transposed as (in, out).
    bound = 1.0 / jnp.sqrt(jnp.float32(D))
    w_pre = jax.random.uniform(k_wp, (D, D), jnp.float32, -bound, bound)
    w_h = jax.random.uniform(k_wh, (D, D), jnp.float32, -bound, bound)
    w_t = jax.random.uniform(k_wt, (D, D), jnp.float32, -bound, bound)
    b_h = jnp.zeros((D,), jnp.float32)            # self.H.bias.data.zero_()
    b_t = jnp.full((D,), -1.0, jnp.float32)       # self.T.bias.data.fill_(-1)

    # One-time parameter prep (weight fusion hoisted out of the forward path).
    w_pre_p, w_fused, b_fused = prepare_params(w_pre, w_h, b_h, w_t, b_t)

    out = prehighway_highway_forward(proj, resid, w_pre_p, w_fused, b_fused,
                                     n_layers=N_LAYERS)
    out = jax.block_until_ready(out)
    assert out.shape == proj.shape and out.dtype == proj.dtype

    expected = reference_f32(proj, resid, w_pre, w_h, b_h, w_t, b_t, N_LAYERS)
    assert jnp.allclose(out, expected, atol=1e-3, rtol=1e-3), \
        "mismatch vs f32 PyTorch-semantics reference"

    print("KERNEL_OK")
</pallas_src>

<mosaic_0001>
module attributes {stable_mosaic.version = 11 : i64} {
  func.func @prehighway_highway_kernel(%arg0: i32, %arg1: memref<128x128xf32, #tpu.memory_space<vmem>>, %arg2: memref<128x128xf32, #tpu.memory_space<vmem>>, %arg3: memref<128x128xf32, #tpu.memory_space<vmem>>, %arg4: memref<128x256xf32, #tpu.memory_space<vmem>>, %arg5: memref<1x256xf32, #tpu.memory_space<vmem>>, %arg6: memref<128x128xf32, #tpu.memory_space<vmem>>) attributes {dimension_semantics = [#tpu.dimension_semantics<parallel>], iteration_bounds = array<i64: 1>, scalar_prefetch = 0 : i64, scratch_operands = 0 : i64, tpu.core_type = #tpu.core_type<tc>, window_params = [{transform_indices = @transform_0, window_bounds = array<i64: 128, 128>}, {transform_indices = @transform_1, window_bounds = array<i64: 128, 128>}, {pipeline_mode = #tpu.pipeline_mode<synchronous>, transform_indices = @transform_2, window_bounds = array<i64: 128, 128>}, {pipeline_mode = #tpu.pipeline_mode<synchronous>, transform_indices = @transform_3, window_bounds = array<i64: 128, 256>}, {pipeline_mode = #tpu.pipeline_mode<synchronous>, transform_indices = @transform_4, window_bounds = array<i64: 1, 256>}, {transform_indices = @transform_5, window_bounds = array<i64: 128, 128>}]} {
    %c0 = arith.constant 0 : index
    %c0_0 = arith.constant 0 : index
    %0 = vector.load %arg3[%c0, %c0_0] : memref<128x128xf32, #tpu.memory_space<vmem>>, vector<128x128xf32>
    %c0_1 = arith.constant 0 : index
    %c0_2 = arith.constant 0 : index
    %1 = vector.load %arg4[%c0_1, %c0_2] : memref<128x256xf32, #tpu.memory_space<vmem>>, vector<128x256xf32>
    %c0_3 = arith.constant 0 : index
    %c0_4 = arith.constant 0 : index
    %2 = vector.load %arg5[%c0_3, %c0_4] : memref<1x256xf32, #tpu.memory_space<vmem>>, vector<1x256xf32>
    %c0_5 = arith.constant 0 : index
    %c0_6 = arith.constant 0 : index
    %3 = vector.load %arg1[%c0_5, %c0_6] : memref<128x128xf32, #tpu.memory_space<vmem>>, vector<128x128xf32>
    %cst = arith.constant dense<0.000000e+00> : vector<128x128xf32>
    %4 = tpu.matmul %3, %0, %cst {dimension_numbers = #tpu.dot_dimension_numbers<[1], [0], [0], [1], [0, 0, 1, 1], [], []>} : vector<128x128xf32>, vector<128x128xf32>, vector<128x128xf32> -> vector<128x128xf32>
    %c0_7 = arith.constant 0 : index
    %c0_8 = arith.constant 0 : index
    %5 = vector.load %arg2[%c0_7, %c0_8] : memref<128x128xf32, #tpu.memory_space<vmem>>, vector<128x128xf32>
    %6 = arith.addf %4, %5 : vector<128x128xf32>
    %c0_i32 = arith.constant 0 : i32
    %cst_9 = arith.constant dense<0.000000e+00> : vector<128x256xf32>
    %7 = tpu.matmul %6, %1, %cst_9 {dimension_numbers = #tpu.dot_dimension_numbers<[1], [0], [0], [1], [0, 0, 1, 1], [], []>} : vector<128x128xf32>, vector<128x256xf32>, vector<128x256xf32> -> vector<128x256xf32>
    %8 = vector.broadcast %2 : vector<1x256xf32> to vector<128x256xf32>
    %9 = arith.addf %7, %8 : vector<128x256xf32>
    %10 = vector.extract_strided_slice %9 {offsets = [0, 0], sizes = [128, 128], strides = [1, 1]} : vector<128x256xf32> to vector<128x128xf32>
    %cst_10 = arith.constant 0.000000e+00 : f32
    %11 = vector.broadcast %cst_10 : f32 to vector<128x128xf32>
    %12 = arith.maximumf %10, %11 : vector<128x128xf32>
    %13 = vector.extract_strided_slice %9 {offsets = [0, 128], sizes = [128, 128], strides = [1, 1]} : vector<128x256xf32> to vector<128x128xf32>
    %cst_11 = arith.constant 5.000000e-01 : f32
    %14 = vector.broadcast %cst_11 : f32 to vector<128x128xf32>
    %15 = arith.mulf %14, %13 : vector<128x128xf32>
    %16 = math.tanh %15 : vector<128x128xf32>
    %cst_12 = arith.constant 5.000000e-01 : f32
    %17 = vector.broadcast %cst_12 : f32 to vector<128x128xf32>
    %18 = arith.mulf %17, %16 : vector<128x128xf32>
    %cst_13 = arith.constant 5.000000e-01 : f32
    %19 = vector.broadcast %cst_13 : f32 to vector<128x128xf32>
    %20 = arith.addf %18, %19 : vector<128x128xf32>
    %21 = arith.subf %12, %6 : vector<128x128xf32>
    %22 = arith.mulf %20, %21 : vector<128x128xf32>
    %23 = arith.addf %6, %22 : vector<128x128xf32>
    %c1_i32 = arith.constant 1 : i32
    %cst_14 = arith.constant dense<0.000000e+00> : vector<128x256xf32>
    %24 = tpu.matmul %23, %1, %cst_14 {dimension_numbers = #tpu.dot_dimension_numbers<[1], [0], [0], [1], [0, 0, 1, 1], [], []>} : vector<128x128xf32>, vector<128x256xf32>, vector<128x256xf32> -> vector<128x256xf32>
    %25 = vector.broadcast %2 : vector<1x256xf32> to vector<128x256xf32>
    %26 = arith.addf %24, %25 : vector<128x256xf32>
    %27 = vector.extract_strided_slice %26 {offsets = [0, 0], sizes = [128, 128], strides = [1, 1]} : vector<128x256xf32> to vector<128x128xf32>
    %cst_15 = arith.constant 0.000000e+00 : f32
    %28 = vector.broadcast %cst_15 : f32 to vector<128x128xf32>
    %29 = arith.maximumf %27, %28 : vector<128x128xf32>
    %30 = vector.extract_strided_slice %26 {offsets = [0, 128], sizes = [128, 128], strides = [1, 1]} : vector<128x256xf32> to vector<128x128xf32>
    %cst_16 = arith.constant 5.000000e-01 : f32
    %31 = vector.broadcast %cst_16 : f32 to vector<128x128xf32>
    %32 = arith.mulf %31, %30 : vector<128x128xf32>
    %33 = math.tanh %32 : vector<128x128xf32>
    %cst_17 = arith.constant 5.000000e-01 : f32
    %34 = vector.broadcast %cst_17 : f32 to vector<128x128xf32>
    %35 = arith.mulf %34, %33 : vector<128x128xf32>
    %cst_18 = arith.constant 5.000000e-01 : f32
    %36 = vector.broadcast %cst_18 : f32 to vector<128x128xf32>
    %37 = arith.addf %35, %36 : vector<128x128xf32>
    %38 = arith.subf %29, %23 : vector<128x128xf32>
    %39 = arith.mulf %37, %38 : vector<128x128xf32>
    %40 = arith.addf %23, %39 : vector<128x128xf32>
    %c2_i32 = arith.constant 2 : i32
    %cst_19 = arith.constant dense<0.000000e+00> : vector<128x256xf32>
    %41 = tpu.matmul %40, %1, %cst_19 {dimension_numbers = #tpu.dot_dimension_numbers<[1], [0], [0], [1], [0, 0, 1, 1], [], []>} : vector<128x128xf32>, vector<128x256xf32>, vector<128x256xf32> -> vector<128x256xf32>
    %42 = vector.broadcast %2 : vector<1x256xf32> to vector<128x256xf32>
    %43 = arith.addf %41, %42 : vector<128x256xf32>
    %44 = vector.extract_strided_slice %43 {offsets = [0, 0], sizes = [128, 128], strides = [1, 1]} : vector<128x256xf32> to vector<128x128xf32>
    %cst_20 = arith.constant 0.000000e+00 : f32
    %45 = vector.broadcast %cst_20 : f32 to vector<128x128xf32>
    %46 = arith.maximumf %44, %45 : vector<128x128xf32>
    %47 = vector.extract_strided_slice %43 {offsets = [0, 128], sizes = [128, 128], strides = [1, 1]} : vector<128x256xf32> to vector<128x128xf32>
    %cst_21 = arith.constant 5.000000e-01 : f32
    %48 = vector.broadcast %cst_21 : f32 to vector<128x128xf32>
    %49 = arith.mulf %48, %47 : vector<128x128xf32>
    %50 = math.tanh %49 : vector<128x128xf32>
    %cst_22 = arith.constant 5.000000e-01 : f32
    %51 = vector.broadcast %cst_22 : f32 to vector<128x128xf32>
    %52 = arith.mulf %51, %50 : vector<128x128xf32>
    %cst_23 = arith.constant 5.000000e-01 : f32
    %53 = vector.broadcast %cst_23 : f32 to vector<128x128xf32>
    %54 = arith.addf %52, %53 : vector<128x128xf32>
    %55 = arith.subf %46, %40 : vector<128x128xf32>
    %56 = arith.mulf %54, %55 : vector<128x128xf32>
    %57 = arith.addf %40, %56 : vector<128x128xf32>
    %c3_i32 = arith.constant 3 : i32
    %cst_24 = arith.constant dense<0.000000e+00> : vector<128x256xf32>
    %58 = tpu.matmul %57, %1, %cst_24 {dimension_numbers = #tpu.dot_dimension_numbers<[1], [0], [0], [1], [0, 0, 1, 1], [], []>} : vector<128x128xf32>, vector<128x256xf32>, vector<128x256xf32> -> vector<128x256xf32>
    %59 = vector.broadcast %2 : vector<1x256xf32> to vector<128x256xf32>
    %60 = arith.addf %58, %59 : vector<128x256xf32>
    %61 = vector.extract_strided_slice %60 {offsets = [0, 0], sizes = [128, 128], strides = [1, 1]} : vector<128x256xf32> to vector<128x128xf32>
    %cst_25 = arith.constant 0.000000e+00 : f32
    %62 = vector.broadcast %cst_25 : f32 to vector<128x128xf32>
    %63 = arith.maximumf %61, %62 : vector<128x128xf32>
    %64 = vector.extract_strided_slice %60 {offsets = [0, 128], sizes = [128, 128], strides = [1, 1]} : vector<128x256xf32> to vector<128x128xf32>
    %cst_26 = arith.constant 5.000000e-01 : f32
    %65 = vector.broadcast %cst_26 : f32 to vector<128x128xf32>
    %66 = arith.mulf %65, %64 : vector<128x128xf32>
    %67 = math.tanh %66 : vector<128x128xf32>
    %cst_27 = arith.constant 5.000000e-01 : f32
    %68 = vector.broadcast %cst_27 : f32 to vector<128x128xf32>
    %69 = arith.mulf %68, %67 : vector<128x128xf32>
    %cst_28 = arith.constant 5.000000e-01 : f32
    %70 = vector.broadcast %cst_28 : f32 to vector<128x128xf32>
    %71 = arith.addf %69, %70 : vector<128x128xf32>
    %72 = arith.subf %63, %57 : vector<128x128xf32>
    %73 = arith.mulf %71, %72 : vector<128x128xf32>
    %74 = arith.addf %57, %73 : vector<128x128xf32>
    %c0_29 = arith.constant 0 : index
    %c0_30 = arith.constant 0 : index
    %75 = vector.load %arg6[%c0_29, %c0_30] : memref<128x128xf32, #tpu.memory_space<vmem>>, vector<128x128xf32>
    tpu.vector_store %arg6[%c0_29, %c0_30], %74 {strides = array<i32>} : memref<128x128xf32, #tpu.memory_space<vmem>>, vector<128x128xf32>,
    return
  }
  func.func @transform_0(%arg0: i32) -> (i32, i32) {
    %c0_i32 = arith.constant 0 : i32
    %c0_i32_0 = arith.constant 0 : i32
    return %arg0, %c0_i32 : i32, i32
  }
  func.func @transform_1(%arg0: i32) -> (i32, i32) {
    %c0_i32 = arith.constant 0 : i32
    %c0_i32_0 = arith.constant 0 : i32
    return %arg0, %c0_i32 : i32, i32
  }
  func.func @transform_2(%arg0: i32) -> (i32, i32) {
    %c0_i32 = arith.constant 0 : i32
    %c0_i32_0 = arith.constant 0 : i32
    %c0_i32_1 = arith.constant 0 : i32
    return %c0_i32, %c0_i32_0 : i32, i32
  }
  func.func @transform_3(%arg0: i32) -> (i32, i32) {
    %c0_i32 = arith.constant 0 : i32
    %c0_i32_0 = arith.constant 0 : i32
    %c0_i32_1 = arith.constant 0 : i32
    return %c0_i32, %c0_i32_0 : i32, i32
  }
  func.func @transform_4(%arg0: i32) -> (i32, i32) {
    %c0_i32 = arith.constant 0 : i32
    %c0_i32_0 = arith.constant 0 : i32
    %c0_i32_1 = arith.constant 0 : i32
    return %c0_i32, %c0_i32_0 : i32, i32
  }
  func.func @transform_5(%arg0: i32) -> (i32, i32) {
    %c0_i32 = arith.constant 0 : i32
    %c0_i32_0 = arith.constant 0 : i32
    return %arg0, %c0_i32 : i32, i32
  }
}

</mosaic_0001>

<bundles_post_ra>
// kernel: tpu_custom_call.1
= control target key start
LH: loop header
LB: loop body
LE: loop exit
PB: predicated region body
PF: predicated region fallthrough
CT: control target
= control target key end

     0   :  { %10 = vsyncpa [#allocation3], 0  ;;  %s2728_s0 = inlined_call_operand.hbm [shape: f32[128,128], index: 0, kind: input, shape index: {}]   ;;  %s2729_s1 = inlined_call_operand.hbm [shape: f32[128,128], index: 1, kind: input, shape index: {}]   ;;  %s2730_s2 = inlined_call_operand.hbm [shape: f32[128,128], index: 2, kind: input, shape index: {}]   ;;  %s2731_s3 = inlined_call_operand.hbm [shape: f32[128,256], index: 3, kind: input, shape index: {}]   ;;  %s2732_s4 = inlined_call_operand.vmem [shape: f32[1,256], index: 4, kind: input, shape index: {}]   ;;  %s2733_s5 = inlined_call_operand.hbm [shape: f32[128,128], index: 5, kind: output, shape index: {}]  }
   0x1   :  { %11 = vsyncpa [#allocation6], 0 }
   0x2   :  { %12 = vsyncpa [#allocation9], 0 }
   0x3   :  { %13 = vsyncpa [#allocation4], 0  ;;  %s1901_s18 = smov [#allocation5]   ;;  %s1902_s20 = smov [#allocation2]  }
   0x4   :  { %s31_s19 = sshll.u32 %s1901_s18, 4  ;;  %s19_s21 = sshll.u32 %s1902_s20, 4  ;;  %s32_s19 = int_to_ptr.vmem [resolvable:$true] %s31_s19  ;;  %s20_s21 = int_to_ptr.vmem [resolvable:$true] %s19_s21 }
   0x5   :  { %s1801_s22 = scalar_lea.vmem %s32_s19, 2048  ;;  %p1806_p1 = scmp.lt.s32.totalorder %s32_s19, %s32_s19 }
   0x6   :  { %p1802_p0 = scmp.ne.s32.totalorder %s32_s19, %s1801_s22  ;;  %p1807_p2 = scmp.lt.s32.totalorder %s1801_s22, %s1801_s22 }
   0x8   :  { %p1808_p3 = por %p1807_p2, %p1806_p1 }
   0xa   :  { %p1809_p4 = pnand %p1808_p3, %p1802_p0 }
   0xc   :  { %1812 = shalt.err (!%p1809_p4)
}
   0xd   :  { %s1903_s23 = smov 128   ;;  %s1904_s24 = smov 8  }
   0xe   :  { %37 = dma.hbm_to_vmem [thread:$0]  %s2729_s1, 2048, %s32_s19, [#allocation6], %s1903_s23, %s1903_s23, %s1904_s24  }
   0xf   :  { %s1821_s27 = scalar_lea.vmem %s20_s21, 2048  ;;  %p1826_p6 = scmp.lt.s32.totalorder %s20_s21, %s20_s21 }
  0x10   :  { %p1822_p5 = scmp.ne.s32.totalorder %s20_s21, %s1821_s27  ;;  %p1827_p7 = scmp.lt.s32.totalorder %s1821_s27, %s1821_s27 }
  0x12   :  { %p1828_p8 = por %p1827_p7, %p1826_p6 }
  0x14   :  { %p1829_p9 = pnand %p1828_p8, %p1822_p5 }
  0x16   :  { %1832 = shalt.err (!%p1829_p9)
}
  0x17   :  { %25 = dma.hbm_to_vmem [thread:$0]  %s2728_s0, 2048, %s20_s21, [#allocation3], %s1903_s23, %s1903_s23, %s1904_s24  }
  0x18   :  { %s1905_s30 = smov [#allocation7]   ;;  %s1906_s7 = smov [#allocation8]  }
  0x19   :  { %s43_s6 = sshll.u32 %s1905_s30, 4  ;;  %s55_s8 = sshll.u32 %s1906_s7, 4  ;;  %s44_s6 = int_to_ptr.vmem [resolvable:$true] %s43_s6  ;;  %s56_s8 = int_to_ptr.vmem [resolvable:$true] %s55_s8 }
  0x1a   :  { %s1841_s1 = scalar_lea.vmem %s44_s6, 2048  ;;  %p1846_p11 = scmp.lt.s32.totalorder %s44_s6, %s44_s6 }
  0x1b   :  { %p1842_p10 = scmp.ne.s32.totalorder %s44_s6, %s1841_s1  ;;  %p1847_p12 = scmp.lt.s32.totalorder %s1841_s1, %s1841_s1 }
  0x1d   :  { %p1848_p13 = por %p1847_p12, %p1846_p11 }
  0x1f   :  { %p1849_p0 = pnand %p1848_p13, %p1842_p10 }
  0x21   :  { %1852 = shalt.err (!%p1849_p0)
}
  0x22   :  { %49 = dma.hbm_to_vmem [thread:$0]  %s2730_s2, 2048, %s44_s6, [#allocation6], %s1903_s23, %s1903_s23, %s1904_s24  }
  0x23   :  { %s1861_s0 = scalar_lea.vmem %s56_s8, 4096  ;;  %p1866_p2 = scmp.lt.s32.totalorder %s56_s8, %s56_s8 }
  0x24   :  { %p1862_p1 = scmp.ne.s32.totalorder %s56_s8, %s1861_s0  ;;  %p1867_p3 = scmp.lt.s32.totalorder %s1861_s0, %s1861_s0 }
  0x26   :  { %p1868_p4 = por %p1867_p3, %p1866_p2 }
  0x28   :  { %p1869_p5 = pnand %p1868_p4, %p1862_p1 }
  0x2a   :  { %1872 = shalt.err (!%p1869_p5)
}
  0x2b   :  { %s1907_s11 = smov 256   ;;  %s1908_s12 = smov 16  }
  0x2c   :  { %61 = dma.hbm_to_vmem [thread:$0]  %s2731_s3, 4096, %s56_s8, [#allocation9], %s1907_s11, %s1907_s11, %s1908_s12  }
  0x2d   :  { %1893 = dma.done.wait [#allocation3], 2048  }
  0x2e   :  { %1894 = vsyncadd [#allocation3], 4294965248 }
  0x2f   :  { %1895 = dma.done.wait [#allocation6], 4096  }
  0x30   :  { %1896 = vsyncadd [#allocation6], 4294963200 }
  0x31   :  { %1897 = dma.done.wait [#allocation9], 4096  }
  0x32   :  { %1898 = vsyncadd [#allocation9], 4294963200  ;;  %v91_v0 = vld [vmem:[#allocation7 + $0x78] sm:$0xff]  ;;  %v90_v1 = vld [vmem:[#allocation7 + $0x70] sm:$0xff] }
  0x33   :  { %1536 = vmatprep.subr.mxu0 %v91_v0  ;;  %v89_v2 = vld [vmem:[#allocation7 + $0x68] sm:$0xff]  ;;  %v88_v3 = vld [vmem:[#allocation7 + $0x60] sm:$0xff]  ;;  %v87_v5 = vld [vmem:[#allocation7 + $0x58] sm:$0xff] }
  0x34   :  { %1537 = vmatpush3.msra.mxu0 %v91_v0  ;;  %v125_v4 = vld [vmem:[#allocation2] sm:$0xff]  ;;  %v86_v6 = vld [vmem:[#allocation7 + $0x50] sm:$0xff]  ;;  %v85_v7 = vld [vmem:[#allocation7 + $0x48] sm:$0xff]  ;;  %v2734_v0 = vmov 0.0  }
  0x35   :  { %1538 = vmatprep.subr.mxu0 %v90_v1  ;;  %1568 = vmatprep.mubr.f32.mxu0 %v125_v4  ;;  %v1962_v8 = vld [vmem:[#allocation8 + $0xf8] sm:$0xff]  ;;  %v1965_v9 = vld [vmem:[#allocation8 + $0xf0] sm:$0xff]  ;;  %v1967_v10 = vld [vmem:[#allocation8 + $0xe8] sm:$0xff] }
  0x36   :  { %1539 = vmatpush3.msra.mxu0 %v90_v1  ;;  %313 = vmatprep.subr.mxu1 %v1962_v8  ;;  %v1969_v11 = vld [vmem:[#allocation8 + $0xe0] sm:$0xff]  ;;  %v1972_v13 = vld [vmem:[#allocation8 + $0xd8] sm:$0xff]  ;;  %v1975_v14 = vld [vmem:[#allocation8 + $0xd0] sm:$0xff] }
  0x37   :  { %1540 = vmatprep.subr.mxu0 %v89_v2  ;;  %v84_v12 = vld [vmem:[#allocation7 + $0x40] sm:$0xff]  ;;  %314 = vmatpush1.msra.mxu1 %v1965_v9  ;;  %v83_v15 = vld [vmem:[#allocation7 + $0x38] sm:$0xff]  ;;  %v1978_v16 = vld [vmem:[#allocation8 + $0xc8] sm:$0xff] }
  0x38   :  { %1541 = vmatpush3.msra.mxu0 %v89_v2  ;;  %315 = vmatprep.subr.mxu1 %v1967_v10  ;;  %v1981_v17 = vld [vmem:[#allocation8 + $0xc0] sm:$0xff]  ;;  %v82_v18 = vld [vmem:[#allocation7 + $0x30] sm:$0xff]  ;;  %v1984_v19 = vld [vmem:[#allocation8 + $0xb8] sm:$0xff] }
  0x39   :  { %1542 = vmatprep.subr.mxu0 %v88_v3  ;;  %316 = vmatpush1.msra.mxu1 %v1969_v11  ;;  %v1987_v20 = vld [vmem:[#allocation8 + $0xb0] sm:$0xff]  ;;  %v81_v21 = vld [vmem:[#allocation7 + $0x28] sm:$0xff]  ;;  %v1993_v23 = vld [vmem:[#allocation8 + $0xa0] sm:$0xff] }
  0x3a   :  { %1543 = vmatpush3.msra.mxu0 %v88_v3  ;;  %317 = vmatprep.subr.mxu1 %v1972_v13  ;;  %v1990_v22 = vld [vmem:[#allocation8 + $0xa8] sm:$0xff]  ;;  %v80_v24 = vld [vmem:[#allocation7 + $0x20] sm:$0xff]  ;;  %v1996_v25 = vld [vmem:[#allocation8 + $0x98] sm:$0xff] }
  0x3b   :  { %1544 = vmatprep.subr.mxu0 %v87_v5  ;;  %318 = vmatpush1.msra.mxu1 %v1975_v14  ;;  %v1999_v26 = vld [vmem:[#allocation8 + $0x90] sm:$0xff]  ;;  %v79_v27 = vld [vmem:[#allocation7 + $0x18] sm:$0xff]  ;;  %v2002_v28 = vld [vmem:[#allocation8 + $0x88] sm:$0xff] }
  0x3c   :  { %1545 = vmatpush3.msra.mxu0 %v87_v5  ;;  %319 = vmatprep.subr.mxu1 %v1978_v16  ;;  %v2005_v29 = vld [vmem:[#allocation8 + $0x80] sm:$0xff]  ;;  %v78_v30 = vld [vmem:[#allocation7 + $0x10] sm:$0xff]  ;;  %v2008_v31 = vld [vmem:[#allocation8 + $0x78] sm:$0xff] }
  0x3d   :  { %1546 = vmatprep.subr.mxu0 %v86_v6  ;;  %320 = vmatpush1.msra.mxu1 %v1981_v17  ;;  %v2011_v32 = vld [vmem:[#allocation8 + $0x70] sm:$0xff]  ;;  %v77_v33 = vld [vmem:[#allocation7 + $0x8] sm:$0xff]  ;;  %v2017_v35 = vld [vmem:[#allocation8 + $0x60] sm:$0xff] }
  0x3e   :  { %1547 = vmatpush3.msra.mxu0 %v86_v6  ;;  %321 = vmatprep.subr.mxu1 %v1984_v19  ;;  %v2014_v34 = vld [vmem:[#allocation8 + $0x68] sm:$0xff]  ;;  %v76_v36 = vld [vmem:[#allocation7] sm:$0xff]  ;;  %v2020_v37 = vld [vmem:[#allocation8 + $0x58] sm:$0xff] }
  0x3f   :  { %1548 = vmatprep.subr.mxu0 %v85_v7  ;;  %322 = vmatpush1.msra.mxu1 %v1987_v20  ;;  %v2023_v38 = vld [vmem:[#allocation8 + $0x50] sm:$0xff]  ;;  %v126_v39 = vld [vmem:[#allocation2 + $0x8] sm:$0xff]  ;;  %v2029_v42 = vld [vmem:[#allocation8 + $0x40] sm:$0xff] }
  0x40   :  { %1549 = vmatpush3.msra.mxu0 %v85_v7  ;;  %323 = vmatprep.subr.mxu1 %v1990_v22  ;;  %v2026_v40 = vld [vmem:[#allocation8 + $0x48] sm:$0xff]  ;;  %v127_v41 = vld [vmem:[#allocation2 + $0x10] sm:$0xff]  ;;  %v2032_v43 = vld [vmem:[#allocation8 + $0x38] sm:$0xff] }
  0x41   :  { %1550 = vmatprep.subr.mxu0 %v84_v12  ;;  %324 = vmatpush1.msra.mxu1 %v1993_v23  ;;  %v2035_v44 = vld [vmem:[#allocation8 + $0x30] sm:$0xff]  ;;  %v128_v45 = vld [vmem:[#allocation2 + $0x18] sm:$0xff]  ;;  %v2038_v46 = vld [vmem:[#allocation8 + $0x28] sm:$0xff] }
  0x42   :  { %1551 = vmatpush3.msra.mxu0 %v84_v12  ;;  %325 = vmatprep.subr.mxu1 %v1996_v25  ;;  %v129_v47 = vld [vmem:[#allocation2 + $0x20] sm:$0xff]  ;;  %v130_v48 = vld [vmem:[#allocation2 + $0x28] sm:$0xff]  ;;  %v131_v49 = vld [vmem:[#allocation2 + $0x30] sm:$0xff] }
  0x43   :  { %1552 = vmatprep.subr.mxu0 %v83_v15  ;;  %326 = vmatpush1.msra.mxu1 %v1999_v26  ;;  %v132_v50 = vld [vmem:[#allocation2 + $0x38] sm:$0xff]  ;;  %v133_v51 = vld [vmem:[#allocation2 + $0x40] sm:$0xff]  ;;  %v134_v52 = vld [vmem:[#allocation2 + $0x48] sm:$0xff] }
  0x44   :  { %1553 = vmatpush3.msra.mxu0 %v83_v15  ;;  %327 = vmatprep.subr.mxu1 %v2002_v28  ;;  %v135_v53 = vld [vmem:[#allocation2 + $0x50] sm:$0xff]  ;;  %v136_v54 = vld [vmem:[#allocation2 + $0x58] sm:$0xff]  ;;  %v137_v55 = vld [vmem:[#allocation2 + $0x60] sm:$0xff] }
  0x45   :  { %1554 = vmatprep.subr.mxu0 %v82_v18  ;;  %328 = vmatpush1.msra.mxu1 %v2005_v29  ;;  %v138_v56 = vld [vmem:[#allocation2 + $0x68] sm:$0xff]  ;;  %v139_v57 = vld [vmem:[#allocation2 + $0x70] sm:$0xff]  ;;  %v140_v58 = vld [vmem:[#allocation2 + $0x78] sm:$0xff] }
  0x46   :  { %1555 = vmatpush3.msra.mxu0 %v82_v18  ;;  %329 = vmatprep.subr.mxu1 %v2008_v31  ;;  %v2070_v59 = vld [vmem:[#allocation8 + $0x20] sm:$0xff]  ;;  %v2073_v60 = vld [vmem:[#allocation8 + $0x18] sm:$0xff]  ;;  %v2077_v61 = vld [vmem:[#allocation8 + $0x10] sm:$0xff] }
  0x47   :  { %1556 = vmatprep.subr.mxu0 %v81_v21  ;;  %330 = vmatpush1.msra.mxu1 %v2011_v32  ;;  %v2081_v62 = vld [vmem:[#allocation8 + $0x8] sm:$0xff]  ;;  %v2085_v63 = vld [vmem:[#allocation8] sm:$0xff]  ;;  %v143_v15 = vld [vmem:[#allocation5 + $0x10] sm:$0xff] }
  0x48   :  { %1557 = vmatpush3.msra.mxu0 %v81_v21  ;;  %331 = vmatprep.subr.mxu1 %v2014_v34  ;;  %2750 = vst [vmem:[#allocation15_spill] sm:$0xff] %v2081_v62  ;;  %2751 = vst [vmem:[#allocation16_spill] sm:$0xff] %v2085_v63  ;;  %v141_v2 = vld [vmem:[#allocation5] sm:$0xff]  ;;  %v142_v5 = vld [vmem:[#allocation5 + $0x8] sm:$0xff] }
  0x49   :  { %1558 = vmatprep.subr.mxu0 %v80_v24  ;;  %332 = vmatpush1.msra.mxu1 %v2017_v35  ;;  %v144_v21 = vld [vmem:[#allocation5 + $0x18] sm:$0xff] }
  0x4a   :  { %1559 = vmatpush3.msra.mxu0 %v80_v24  ;;  %333 = vmatprep.subr.mxu1 %v2020_v37 }
  0x4b   :  { %1560 = vmatprep.subr.mxu0 %v79_v27  ;;  %334 = vmatpush1.msra.mxu1 %v2023_v38 }
  0x4c   :  { %1561 = vmatpush3.msra.mxu0 %v79_v27  ;;  %335 = vmatprep.subr.mxu1 %v2026_v40 }
  0x4d   :  { %1562 = vmatprep.subr.mxu0 %v78_v30  ;;  %336 = vmatpush1.msra.mxu1 %v2029_v42 }
  0x4e   :  { %1563 = vmatpush3.msra.mxu0 %v78_v30  ;;  %337 = vmatprep.subr.mxu1 %v2032_v43 }
  0x4f   :  { %1564 = vmatprep.subr.mxu0 %v77_v33  ;;  %338 = vmatpush1.msra.mxu1 %v2035_v44 }
  0x50   :  { %1565 = vmatpush3.msra.mxu0 %v77_v33  ;;  %339 = vmatprep.subr.mxu1 %v2038_v46  ;;  %v145_v33 = vld [vmem:[#allocation5 + $0x20] sm:$0xff] }
  0x51   :  { %1566 = vmatprep.subr.mxu0 %v76_v36  ;;  %340 = vmatpush1.msra.mxu1 %v2070_v59 }
  0x52   :  { %1567 = vmatpush3.msra.mxu0 %v76_v36  ;;  %341 = vmatprep.subr.mxu1 %v2073_v60 }
  0x53   :  { %1569 = vmatmul.mubr.f32.vlgmr.msra.gmra.mxu0 %v126_v39  ;;  %602 = vmatprep.subr.mxu0 %v1962_v8  ;;  %v146_v39 = vld [vmem:[#allocation5 + $0x28] sm:$0xff] }
  0x54   :  { %1571 = vmatprep.mubr.f32.mxu0 %v127_v41  ;;  %603 = vmatpush1.msra.mxu0 %v1965_v9 }
  0x55   :  { %604 = vmatprep.subr.mxu0 %v1967_v10  ;;  %342 = vmatpush1.msra.mxu1 %v2077_v61 }
  0x56   :  { %605 = vmatpush1.msra.mxu0 %v1969_v11  ;;  %343 = vmatprep.subr.mxu1 %v2081_v62 }
  0x57   :  { %1572 = vmatmul.mubr.f32.gmra.mxu0 %v128_v45  ;;  %606 = vmatprep.subr.mxu0 %v1972_v13 }
  0x58   :  { %1574 = vmatprep.mubr.f32.mxu0 %v129_v47  ;;  %607 = vmatpush1.msra.mxu0 %v1975_v14 }
  0x59   :  { %608 = vmatprep.subr.mxu0 %v1978_v16  ;;  %344 = vmatpush1.msra.mxu1 %v2085_v63 }
  0x5a   :  { %609 = vmatpush1.msra.mxu0 %v1981_v17  ;;  %377 = vmatprep.mubr.f32.mxu1 %v2734_v0 }
  0x5b   :  { %1575 = vmatmul.mubr.f32.gmra.mxu0 %v130_v48  ;;  %610 = vmatprep.subr.mxu0 %v1984_v19  ;;  %v147_v48 = vld [vmem:[#allocation5 + $0x30] sm:$0xff] }
  0x5c   :  { %1577 = vmatprep.mubr.f32.mxu0 %v131_v49  ;;  %611 = vmatpush1.msra.mxu0 %v1987_v20 }
  0x5d   :  { %612 = vmatprep.subr.mxu0 %v1990_v22  ;;  %891 = vmatprep.subr.mxu1 %v1962_v8 }
  0x5e   :  { %613 = vmatpush1.msra.mxu0 %v1993_v23 }
  0x5f   :  { %1578 = vmatmul.mubr.f32.gmra.mxu0 %v132_v50  ;;  %614 = vmatprep.subr.mxu0 %v1996_v25  ;;  %v148_v50 = vld [vmem:[#allocation5 + $0x38] sm:$0xff] }
  0x60   :  { %1580 = vmatprep.mubr.f32.mxu0 %v133_v51  ;;  %615 = vmatpush1.msra.mxu0 %v1999_v26 }
  0x61   :  { %616 = vmatprep.subr.mxu0 %v2002_v28 }
  0x62   :  { %617 = vmatpush1.msra.mxu0 %v2005_v29 }
  0x63   :  { %1581 = vmatmul.mubr.f32.gmra.mxu0 %v134_v52  ;;  %618 = vmatprep.subr.mxu0 %v2008_v31 }
  0x64   :  { %1583 = vmatprep.mubr.f32.mxu0 %v135_v53  ;;  %619 = vmatpush1.msra.mxu0 %v2011_v32 }
  0x65   :  { %620 = vmatprep.subr.mxu0 %v2014_v34 }
  0x66   :  { %621 = vmatpush1.msra.mxu0 %v2017_v35 }
  0x67   :  { %1584 = vmatmul.mubr.f32.gmra.mxu0 %v136_v54  ;;  %622 = vmatprep.subr.mxu0 %v2020_v37  ;;  %v149_v54 = vld [vmem:[#allocation5 + $0x40] sm:$0xff] }
  0x68   :  { %1586 = vmatprep.mubr.f32.mxu0 %v137_v55  ;;  %623 = vmatpush1.msra.mxu0 %v2023_v38 }
  0x69   :  { %624 = vmatprep.subr.mxu0 %v2026_v40 }
  0x6a   :  { %625 = vmatpush1.msra.mxu0 %v2029_v42 }
  0x6b   :  { %1587 = vmatmul.mubr.f32.gmra.mxu0 %v138_v56  ;;  %626 = vmatprep.subr.mxu0 %v2032_v43  ;;  %v150_v56 = vld [vmem:[#allocation5 + $0x48] sm:$0xff] }
  0x6c   :  { %1589 = vmatprep.mubr.f32.mxu0 %v139_v57  ;;  %627 = vmatpush1.msra.mxu0 %v2035_v44 }
  0x6d   :  { %628 = vmatprep.subr.mxu0 %v2038_v46 }
  0x6e   :  { %629 = vmatpush1.msra.mxu0 %v2070_v59 }
  0x6f   :  { %1590 = vmatmul.mubr.f32.gmra.mxu0 %v140_v58  ;;  %630 = vmatprep.subr.mxu0 %v2073_v60 }
  0x70   :  { %631 = vmatpush1.msra.mxu0 %v2077_v61  ;;  %666 = vmatprep.mubr.f32.mxu0 %v2734_v0 }
  0x71   :  { %632 = vmatprep.subr.mxu0 %v2081_v62 }
  0x72   :  { %633 = vmatpush1.msra.mxu0 %v2085_v63 }
  0x73   :  { %1180 = vmatprep.subr.mxu0 %v1962_v8 }
 0x113   :  { %v1570_v1 = vpop.f32.mrf.mxu0 }
 0x114   :  { %v2099_v7 = vadd.f32 %v1570_v1, %v142_v5  ;;  %v152_v5 = vld [vmem:[#allocation5 + $0x58] sm:$0xff] }
 0x115   :  { %v223_v3 = vpop.f32.mrf.mxu0 }
 0x116   :  { %v2094_v4 = vadd.f32 %v223_v3, %v141_v2  ;;  %v151_v2 = vld [vmem:[#allocation5 + $0x50] sm:$0xff] }
 0x117   :  { %v1573_v6 = vpop.f32.mrf.mxu0 }
 0x118   :  { %378 = vmatmul.mubr.f32.vlgmr.msra.gmra.mxu1 %v2094_v4  ;;  %v2115_v27 = vadd.f32 %v1573_v6, %v144_v21 }
 0x119   :  { %383 = vmatprep.mubr.f32.mxu1 %v2734_v0  ;;  %892 = vmatpush1.msra.mxu1 %v1965_v9  ;;  %v233_v12 = vpop.f32.mrf.mxu0 }
 0x11a   :  { %893 = vmatprep.subr.mxu1 %v1967_v10  ;;  %v2107_v18 = vadd.f32 %v233_v12, %v143_v15  ;;  %v153_v15 = vld [vmem:[#allocation5 + $0x60] sm:$0xff] }
 0x11b   :  { %894 = vmatpush1.msra.mxu1 %v1969_v11  ;;  %v1576_v24 = vpop.f32.mrf.mxu0 }
 0x11c   :  { %384 = vmatmul.mubr.f32.gmra.mxu1 %v2099_v7  ;;  %895 = vmatprep.subr.mxu1 %v1972_v13  ;;  %v2131_v45 = vadd.f32 %v1576_v24, %v146_v39  ;;  %v154_v24 = vld [vmem:[#allocation5 + $0x68] sm:$0xff] }
 0x11d   :  { %389 = vmatprep.mubr.f32.mxu1 %v2734_v0  ;;  %896 = vmatpush1.msra.mxu1 %v1975_v14  ;;  %v243_v30 = vpop.f32.mrf.mxu0 }
 0x11e   :  { %897 = vmatprep.subr.mxu1 %v1978_v16  ;;  %v2123_v36 = vadd.f32 %v243_v30, %v145_v33 }
 0x11f   :  { %898 = vmatpush1.msra.mxu1 %v1981_v17  ;;  %v1579_v41 = vpop.f32.mrf.mxu0 }
 0x120   :  { %390 = vmatmul.mubr.f32.gmra.mxu1 %v2107_v18  ;;  %899 = vmatprep.subr.mxu1 %v1984_v19  ;;  %v2147_v52 = vadd.f32 %v1579_v41, %v148_v50  ;;  %v155_v41 = vld [vmem:[#allocation5 + $0x70] sm:$0xff] }
 0x121   :  { %395 = vmatprep.mubr.f32.mxu1 %v2734_v0  ;;  %900 = vmatpush1.msra.mxu1 %v1987_v20  ;;  %v253_v47 = vpop.f32.mrf.mxu0 }
 0x122   :  { %901 = vmatprep.subr.mxu1 %v1990_v22  ;;  %v2139_v49 = vadd.f32 %v253_v47, %v147_v48  ;;  %v156_v48 = vld [vmem:[#allocation5 + $0x78] sm:$0xff] }
 0x123   :  { %902 = vmatpush1.msra.mxu1 %v1993_v23  ;;  %v1582_v51 = vpop.f32.mrf.mxu0 }
 0x124   :  { %396 = vmatmul.mubr.f32.gmra.mxu1 %v2115_v27  ;;  %903 = vmatprep.subr.mxu1 %v1996_v25  ;;  %v2162_v58 = vadd.f32 %v1582_v51, %v150_v56  ;;  %v303_v51 = vlaneseq  ;;  %v124_v56 = vld [vmem:[%s2732_s4] sm:$0x3]  ;;  %s1910_s4 = smov [#allocation10]  }
 0x125   :  { %401 = vmatprep.mubr.f32.mxu1 %v2734_v0  ;;  %904 = vmatpush1.msra.mxu1 %v1999_v26  ;;  %v263_v53 = vpop.f32.mrf.mxu0  ;;  %s1490_s15 = sshll.u32 %s1910_s4, 4  ;;  %s1491_s15 = int_to_ptr.vmem [resolvable:$true] %s1490_s15 }
 0x126   :  { %905 = vmatprep.subr.mxu1 %v2002_v28  ;;  %v2155_v55 = vadd.f32 %v263_v53, %v149_v54  ;;  %v304_v53 = vshrl.u32 %v303_v51, 7  ;;  %s1873_s16 = scalar_lea.vmem %s1491_s15, 2048  ;;  %p1878_p7 = scmp.lt.s32.totalorder %s1491_s15, %s1491_s15 }
 0x127   :  { %906 = vmatpush1.msra.mxu1 %v2005_v29  ;;  %v1585_v57 = vpop.f32.mrf.mxu0  ;;  %p1874_p6 = scmp.ne.s32.totalorder %s1491_s15, %s1873_s16  ;;  %p1879_p8 = scmp.lt.s32.totalorder %s1873_s16, %s1873_s16 }
 0x128   :  { %402 = vmatmul.mubr.f32.gmra.mxu1 %v2123_v36  ;;  %907 = vmatprep.subr.mxu1 %v2008_v31  ;;  %v2170_v12 = vadd.f32 %v1585_v57, %v152_v5  ;;  %v309_v54 = vsub.s32 1, %v304_v53 }
 0x129   :  { %407 = vmatprep.mubr.f32.mxu1 %v2734_v0  ;;  %908 = vmatpush1.msra.mxu1 %v2011_v32  ;;  %v273_v1 = vpop.f32.mrf.mxu0  ;;  %p1880_p9 = por %p1879_p8, %p1878_p7 }
 0x12a   :  { %909 = vmatprep.subr.mxu1 %v2014_v34  ;;  %v2166_v3 = vadd.f32 %v273_v1, %v151_v2  ;;  %2753 = vst [vmem:[#allocation18_spill] sm:$0xff] %v2170_v12  ;;  %v2193_v57 = vrot.slane %v124_v56, %v309_v54 }
 0x12b   :  { %910 = vmatpush1.msra.mxu1 %v2017_v35  ;;  %v1588_v6 = vpop.f32.mrf.mxu0  ;;  %p1881_p10 = pnand %p1880_p9, %p1874_p6 }
 0x12c   :  { %408 = vmatmul.mubr.f32.gmra.mxu1 %v2131_v45  ;;  %911 = vmatprep.subr.mxu1 %v2020_v37  ;;  %2752 = vst [vmem:[#allocation17_spill] sm:$0xff] %v2166_v3  ;;  %v2178_v33 = vadd.f32 %v1588_v6, %v154_v24  ;;  %v305_v24 = vsub.s32 0, %v304_v53 }
 0x12d   :  { %413 = vmatprep.mubr.f32.mxu1 %v2734_v0  ;;  %912 = vmatpush1.msra.mxu1 %v2023_v38 }
 0x12e   :  { %913 = vmatprep.subr.mxu1 %v2026_v40  ;;  %2755 = vst [vmem:[#allocation20_spill] sm:$0xff] %v2178_v33  ;;  %v2197_v51 = vrot.slane %v124_v56, %v305_v24 }
 0x12f   :  { %914 = vmatpush1.msra.mxu1 %v2029_v42 }
 0x130   :  { %414 = vmatmul.mubr.f32.gmra.mxu1 %v2139_v49  ;;  %915 = vmatprep.subr.mxu1 %v2032_v43 }
 0x131   :  { %419 = vmatprep.mubr.f32.mxu1 %v2734_v0  ;;  %916 = vmatpush1.msra.mxu1 %v2035_v44 }
 0x132   :  { %917 = vmatprep.subr.mxu1 %v2038_v46 }
 0x133   :  { %918 = vmatpush1.msra.mxu1 %v2070_v59 }
 0x134   :  { %420 = vmatmul.mubr.f32.gmra.mxu1 %v2147_v52  ;;  %919 = vmatprep.subr.mxu1 %v2073_v60 }
 0x135   :  { %425 = vmatprep.mubr.f32.mxu1 %v2734_v0  ;;  %920 = vmatpush1.msra.mxu1 %v2077_v61 }
 0x136   :  { %921 = vmatprep.subr.mxu1 %v2081_v62 }
 0x137   :  { %922 = vmatpush1.msra.mxu1 %v2085_v63 }
 0x138   :  { %426 = vmatmul.mubr.f32.gmra.mxu1 %v2155_v55  ;;  %1592 = vmatprep.subr.mxu1 %v1962_v8  ;;  %v283_v8 = vpop.f32.mrf.mxu0 }
 0x139   :  { %431 = vmatprep.mubr.f32.mxu1 %v2734_v0  ;;  %v2174_v21 = vadd.f32 %v283_v8, %v153_v15 }
 0x13a   :  { %v1591_v30 = vpop.f32.mrf.mxu0 }
 0x13b   :  { %2754 = vst [vmem:[#allocation19_spill] sm:$0xff] %v2174_v21  ;;  %v2186_v50 = vadd.f32 %v1591_v30, %v156_v48 }
 0x13c   :  { %432 = vmatmul.mubr.f32.gmra.mxu1 %v2162_v58  ;;  %v293_v39 = vpop.f32.mrf.mxu0 }
 0x13d   :  { %437 = vmatprep.mubr.f32.mxu1 %v2734_v0  ;;  %v2182_v47 = vadd.f32 %v293_v39, %v155_v41  ;;  %2757 = vst [vmem:[#allocation22_spill] sm:$0xff] %v2186_v50 }
 0x13f   :  { %2756 = vst [vmem:[#allocation21_spill] sm:$0xff] %v2182_v47 }
 0x140   :  { %438 = vmatmul.mubr.f32.gmra.mxu1 %v2166_v3 }
 0x141   :  { %443 = vmatprep.mubr.f32.mxu1 %v2734_v0 }
 0x144   :  { %444 = vmatmul.mubr.f32.gmra.mxu1 %v2170_v12 }
 0x145   :  { %449 = vmatprep.mubr.f32.mxu1 %v2734_v0 }
 0x148   :  { %450 = vmatmul.mubr.f32.gmra.mxu1 %v2174_v21 }
 0x149   :  { %455 = vmatprep.mubr.f32.mxu1 %v2734_v0 }
 0x14c   :  { %456 = vmatmul.mubr.f32.gmra.mxu1 %v2178_v33 }
 0x14d   :  { %461 = vmatprep.mubr.f32.mxu1 %v2734_v0 }
 0x150   :  { %462 = vmatmul.mubr.f32.gmra.mxu1 %v2182_v47 }
 0x151   :  { %467 = vmatprep.mubr.f32.mxu1 %v2734_v0 }
 0x154   :  { %468 = vmatmul.mubr.f32.gmra.mxu1 %v2186_v50 }
 0x155   :  { %955 = vmatprep.mubr.f32.mxu1 %v2734_v0 }
 0x1d8   :  { %v379_v1 = vpop.f32.mrf.mxu1 }
 0x1da   :  { %v381_v2 = vpop.f32.mrf.mxu1 }
 0x1db   :  { %v382_v5 = vadd.f32 %v381_v2, %v2193_v57  ;;  %v380_v2 = vadd.f32 %v379_v1, %v2197_v51 }
 0x1dc   :  { %v385_v6 = vpop.f32.mrf.mxu1 }
 0x1dd   :  { %v490_v8 = vmul.f32 0.5, %v382_v5 }
 0x1de   :  { %v387_v15 = vpop.f32.mrf.mxu1 }
 0x1df   :  { %1634 = vtanh.f32 %v490_v8  ;;  %v388_v30 = vadd.f32 %v387_v15, %v2193_v57  ;;  %v386_v15 = vadd.f32 %v385_v6, %v2197_v51 }
 0x1e0   :  { %v391_v39 = vpop.f32.mrf.mxu1 }
 0x1e1   :  { %v491_v41 = vmul.f32 0.5, %v388_v30  ;;  %v474_v30 = vmax.f32 %v380_v2, 0.0  ;;  %v392_v6 = vadd.f32 %v391_v39, %v2197_v51 }
 0x1e2   :  { %v393_v48 = vpop.f32.mrf.mxu1 }
 0x1e3   :  { %1636 = vtanh.f32 %v491_v41  ;;  %v394_v54 = vadd.f32 %v393_v48, %v2193_v57  ;;  %v554_v1 = vsub.f32 %v474_v30, %v2094_v4 }
 0x1e4   :  { %v397_v0 = vpop.f32.mrf.mxu1 }
 0x1e5   :  { %v492_v50 = vmul.f32 0.5, %v394_v54  ;;  %v475_v54 = vmax.f32 %v386_v15, 0.0 }
 0x1e6   :  { %v399_v47 = vpop.f32.mrf.mxu1 }
 0x1e7   :  { %1638 = vtanh.f32 %v492_v50  ;;  %v400_v5 = vadd.f32 %v399_v47, %v2193_v57  ;;  %v555_v63 = vsub.f32 %v475_v54, %v2099_v7 }
 0x1e8   :  { %v403_v53 = vpop.f32.mrf.mxu1 }
 0x1e9   :  { %v493_v8 = vmul.f32 0.5, %v400_v5 }
 0x1ea   :  { %v405_v33 = vpop.f32.mrf.mxu1 }
 0x1eb   :  { %1640 = vtanh.f32 %v493_v8  ;;  %v406_v56 = vadd.f32 %v405_v33, %v2193_v57 }
 0x1ec   :  { %v1635_v24 = vpop.eup %1634  ;;  %v409_v41 = vpop.f32.mrf.mxu1 }
 0x1ed   :  { %v522_v48 = vmul.f32 0.5, %v1635_v24  ;;  %v494_v21 = vmul.f32 0.5, %v406_v56 }
 0x1ee   :  { %v411_v12 = vpop.f32.mrf.mxu1 }
 0x1ef   :  { %v538_v50 = vadd.f32 0.5, %v522_v48  ;;  %1642 = vtanh.f32 %v494_v21  ;;  %v412_v47 = vadd.f32 %v411_v12, %v2193_v57  ;;  %v476_v12 = vmax.f32 %v392_v6, 0.0 }
 0x1f0   :  { %v1637_v5 = vpop.eup %1636  ;;  %v2207_v3 = vpop.f32.mrf.mxu1  ;;  %v398_v48 = vadd.f32 %v397_v0, %v2197_v51 }
 0x1f1   :  { %v570_v2 = vmul.f32 %v554_v1, %v538_v50  ;;  %v523_v8 = vmul.f32 0.5, %v1637_v5  ;;  %v495_v33 = vmul.f32 0.5, %v412_v47  ;;  %v2758_v47 = vmov 0.0  }
 0x1f2   :  { %v417_v24 = vpop.f32.mrf.mxu1  ;;  %v556_v0 = vsub.f32 %v476_v12, %v2107_v18 }
 0x1f3   :  { %v2211_v15 = vadd.f32 %v570_v2, %v2094_v4  ;;  %v539_v56 = vadd.f32 0.5, %v523_v8  ;;  %1644 = vtanh.f32 %v495_v33  ;;  %v418_v21 = vadd.f32 %v417_v24, %v2193_v57 }
 0x1f4   :  { %v1639_v30 = vpop.eup %1638  ;;  %v2215_v39 = vpop.f32.mrf.mxu1  ;;  %v477_v2 = vmax.f32 %v398_v48, 0.0  ;;  %v404_v8 = vadd.f32 %v403_v53, %v2197_v51 }
 0x1f5   :  { %v524_v62 = vmul.f32 0.5, %v1639_v30  ;;  %v496_v1 = vmul.f32 0.5, %v418_v21  ;;  %667 = vmatmul.mubr.f32.vlgmr.msra.gmra.mxu0 %v2211_v15  ;;  %v571_v50 = vmul.f32 %v555_v63, %v539_v56  ;;  %v410_v30 = vadd.f32 %v409_v41, %v2197_v51 }
 0x1f6   :  { %v423_v54 = vpop.f32.mrf.mxu1  ;;  %672 = vmatprep.mubr.f32.mxu0 %v2758_v47  ;;  %1181 = vmatpush1.msra.mxu0 %v1965_v9  ;;  %v557_v53 = vsub.f32 %v477_v2, %v2115_v27 }
 0x1f7   :  { %v540_v4 = vadd.f32 0.5, %v524_v62  ;;  %1646 = vtanh.f32 %v496_v1  ;;  %v424_v5 = vadd.f32 %v423_v54, %v2193_v57  ;;  %1182 = vmatprep.subr.mxu0 %v1967_v10  ;;  %v2227_v63 = vadd.f32 %v571_v50, %v2099_v7 }
 0x1f8   :  { %v1641_v6 = vpop.eup %1640  ;;  %v2224_v33 = vpop.f32.mrf.mxu1  ;;  %1183 = vmatpush1.msra.mxu0 %v1969_v11  ;;  %v478_v11 = vmax.f32 %v404_v8, 0.0 }
 0x1f9   :  { %v525_v9 = vmul.f32 0.5, %v1641_v6  ;;  %v497_v62 = vmul.f32 0.5, %v424_v5  ;;  %1184 = vmatprep.subr.mxu0 %v1972_v13  ;;  %673 = vmatmul.mubr.f32.gmra.mxu0 %v2227_v63  ;;  %v572_v24 = vmul.f32 %v556_v0, %v540_v4  ;;  %v479_v4 = vmax.f32 %v410_v30, 0.0 }
 0x1fa   :  { %v429_v10 = vpop.f32.mrf.mxu1  ;;  %678 = vmatprep.mubr.f32.mxu0 %v2758_v47  ;;  %1185 = vmatpush1.msra.mxu0 %v1975_v14 }
 0x1fb   :  { %v541_v56 = vadd.f32 0.5, %v525_v9  ;;  %1648 = vtanh.f32 %v497_v62  ;;  %v430_v21 = vadd.f32 %v429_v10, %v2193_v57  ;;  %v2240_v13 = vadd.f32 %v572_v24, %v2107_v18  ;;  %1186 = vmatprep.subr.mxu0 %v1978_v16 }
 0x1fc   :  { %v1643_v7 = vpop.eup %1642  ;;  %v2237_v12 = vpop.f32.mrf.mxu1  ;;  %1187 = vmatpush1.msra.mxu0 %v1981_v17  ;;  %v558_v16 = vsub.f32 %v478_v11, %v2123_v36  ;;  %v416_v17 = vadd.f32 %v2207_v3, %v2197_v51 }
 0x1fd   :  { %v526_v48 = vmul.f32 0.5, %v1643_v7  ;;  %v498_v1 = vmul.f32 0.5, %v430_v21  ;;  %679 = vmatmul.mubr.f32.gmra.mxu0 %v2240_v13  ;;  %v573_v50 = vmul.f32 %v557_v53, %v541_v56  ;;  %1188 = vmatprep.subr.mxu0 %v1984_v19 }
 0x1fe   :  { %v435_v14 = vpop.f32.mrf.mxu1  ;;  %684 = vmatprep.mubr.f32.mxu0 %v2758_v47  ;;  %1189 = vmatpush1.msra.mxu0 %v1987_v20  ;;  %v480_v9 = vmax.f32 %v416_v17, 0.0 }
 0x1ff   :  { %v542_v54 = vadd.f32 0.5, %v526_v48  ;;  %1650 = vtanh.f32 %v498_v1  ;;  %v436_v41 = vadd.f32 %v435_v14, %v2193_v57  ;;  %v2255_v6 = vadd.f32 %v573_v50, %v2115_v27  ;;  %1190 = vmatprep.subr.mxu0 %v1990_v22 }
 0x200   :  { %v1645_v18 = vpop.eup %1644  ;;  %v2252_v5 = vpop.f32.mrf.mxu1  ;;  %1191 = vmatpush1.msra.mxu0 %v1993_v23  ;;  %v559_v22 = vsub.f32 %v479_v4, %v2131_v45  ;;  %v422_v23 = vadd.f32 %v2215_v39, %v2197_v51 }
 0x201   :  { %v527_v19 = vmul.f32 0.5, %v1645_v18  ;;  %v499_v0 = vmul.f32 0.5, %v436_v41  ;;  %685 = vmatmul.mubr.f32.gmra.mxu0 %v2255_v6  ;;  %v574_v2 = vmul.f32 %v558_v16, %v542_v54  ;;  %1192 = vmatprep.subr.mxu0 %v1996_v25 }
 0x202   :  { %v441_v20 = vpop.f32.mrf.mxu1  ;;  %690 = vmatprep.mubr.f32.mxu0 %v2758_v47  ;;  %1193 = vmatpush1.msra.mxu0 %v1999_v26  ;;  %v481_v7 = vmax.f32 %v422_v23, 0.0 }
 0x203   :  { %v543_v8 = vadd.f32 0.5, %v527_v19  ;;  %1652 = vtanh.f32 %v499_v0  ;;  %v442_v3 = vadd.f32 %v441_v20, %v2193_v57  ;;  %v2270_v10 = vadd.f32 %v574_v2, %v2123_v36  ;;  %1194 = vmatprep.subr.mxu0 %v2002_v28 }
 0x204   :  { %v1647_v27 = vpop.eup %1646  ;;  %v2267_v62 = vpop.f32.mrf.mxu1  ;;  %1195 = vmatpush1.msra.mxu0 %v2005_v29  ;;  %v560_v28 = vsub.f32 %v480_v9, %v2139_v49  ;;  %v428_v29 = vadd.f32 %v2224_v33, %v2197_v51 }
 0x205   :  { %v528_v25 = vmul.f32 0.5, %v1647_v27  ;;  %v500_v24 = vmul.f32 0.5, %v442_v3  ;;  %691 = vmatmul.mubr.f32.gmra.mxu0 %v2270_v10  ;;  %v575_v56 = vmul.f32 %v559_v22, %v543_v8  ;;  %1196 = vmatprep.subr.mxu0 %v2008_v31  ;;  %v446_v20 = vadd.f32 %v2267_v62, %v2197_v51  ;;  %v2759_v22 = vld [vmem:[#allocation15_spill] sm:$0xff]  ;;  %v2761_v62 = vld [vmem:[#allocation17_spill] sm:$0xff] }
 0x206   :  { %v447_v26 = vpop.f32.mrf.mxu1  ;;  %696 = vmatprep.mubr.f32.mxu0 %v2758_v47  ;;  %1197 = vmatpush1.msra.mxu0 %v2011_v32  ;;  %v482_v14 = vmax.f32 %v428_v29, 0.0 }
 0x207   :  { %v544_v21 = vadd.f32 0.5, %v528_v25  ;;  %1654 = vtanh.f32 %v500_v24  ;;  %v448_v39 = vadd.f32 %v447_v26, %v2193_v57  ;;  %v2285_v11 = vadd.f32 %v575_v56, %v2131_v45  ;;  %1198 = vmatprep.subr.mxu0 %v2014_v34 }
 0x208   :  { %v1649_v36 = vpop.eup %1648  ;;  %v2282_v53 = vpop.f32.mrf.mxu1  ;;  %1199 = vmatpush1.msra.mxu0 %v2017_v35  ;;  %v561_v34 = vsub.f32 %v481_v7, %v2147_v52  ;;  %v434_v35 = vadd.f32 %v2237_v12, %v2197_v51  ;;  %v485_v24 = vmax.f32 %v446_v20, 0.0  ;;  %v2765_v20 = vld [vmem:[#allocation21_spill] sm:$0xff] }
 0x209   :  { %v529_v31 = vmul.f32 0.5, %v1649_v36  ;;  %v501_v30 = vmul.f32 0.5, %v448_v39  ;;  %697 = vmatmul.mubr.f32.gmra.mxu0 %v2285_v11  ;;  %v576_v48 = vmul.f32 %v560_v28, %v544_v21  ;;  %1200 = vmatprep.subr.mxu0 %v2020_v37  ;;  %v452_v21 = vadd.f32 %v2282_v53, %v2197_v51 }
 0x20a   :  { %v453_v32 = vpop.f32.mrf.mxu1  ;;  %702 = vmatprep.mubr.f32.mxu0 %v2758_v47  ;;  %1201 = vmatpush1.msra.mxu0 %v2023_v38  ;;  %v440_v38 = vadd.f32 %v2252_v5, %v2197_v51  ;;  %v483_v4 = vmax.f32 %v434_v35, 0.0 }
 0x20b   :  { %v545_v1 = vadd.f32 0.5, %v529_v31  ;;  %1656 = vtanh.f32 %v501_v30  ;;  %v454_v33 = vadd.f32 %v453_v32, %v2193_v57  ;;  %v2298_v54 = vadd.f32 %v576_v48, %v2139_v49  ;;  %1202 = vmatprep.subr.mxu0 %v2026_v40  ;;  %v2762_v31 = vld [vmem:[#allocation18_spill] sm:$0xff] }
 0x20c   :  { %v1651_v45 = vpop.eup %1650  ;;  %v457_v50 = vpop.f32.mrf.mxu1  ;;  %1203 = vmatpush1.msra.mxu0 %v2029_v42  ;;  %v562_v42 = vsub.f32 %v482_v14, %v2155_v55  ;;  %v484_v0 = vmax.f32 %v440_v38, 0.0  ;;  %v565_v30 = vsub.f32 %v485_v24, %v2762_v31  ;;  %v486_v53 = vmax.f32 %v452_v21, 0.0  ;;  %v2763_v14 = vld [vmem:[#allocation19_spill] sm:$0xff] }
 0x20d   :  { %v530_v37 = vmul.f32 0.5, %v1651_v45  ;;  %v502_v41 = vmul.f32 0.5, %v454_v33  ;;  %703 = vmatmul.mubr.f32.gmra.mxu0 %v2298_v54  ;;  %v577_v16 = vmul.f32 %v561_v34, %v545_v1  ;;  %1204 = vmatprep.subr.mxu0 %v2032_v43  ;;  %v458_v32 = vadd.f32 %v457_v50, %v2197_v51 }
 0x20e   :  { %v459_v18 = vpop.f32.mrf.mxu1  ;;  %708 = vmatprep.mubr.f32.mxu0 %v2758_v47  ;;  %1205 = vmatpush1.msra.mxu0 %v2035_v44  ;;  %v564_v25 = vsub.f32 %v484_v0, %v2761_v62  ;;  %v566_v35 = vsub.f32 %v486_v53, %v2763_v14 }
 0x20f   :  { %v546_v12 = vadd.f32 0.5, %v530_v37  ;;  %1658 = vtanh.f32 %v502_v41  ;;  %v460_v49 = vadd.f32 %v459_v18, %v2193_v57  ;;  %v2311_v5 = vadd.f32 %v577_v16, %v2147_v52  ;;  %1206 = vmatprep.subr.mxu0 %v2038_v46 }
 0x210   :  { %v1653_v40 = vpop.eup %1652  ;;  %v463_v17 = vpop.f32.mrf.mxu1  ;;  %1207 = vmatpush1.msra.mxu0 %v2070_v59  ;;  %v563_v59 = vsub.f32 %v483_v4, %v2162_v58  ;;  %v487_v34 = vmax.f32 %v458_v32, 0.0 }
 0x211   :  { %v531_v19 = vmul.f32 0.5, %v1653_v40  ;;  %v503_v43 = vmul.f32 0.5, %v460_v49  ;;  %709 = vmatmul.mubr.f32.gmra.mxu0 %v2311_v5  ;;  %v578_v2 = vmul.f32 %v562_v42, %v546_v12  ;;  %1208 = vmatprep.subr.mxu0 %v2073_v60  ;;  %v2760_v60 = vld [vmem:[#allocation16_spill] sm:$0xff]  ;;  %v464_v50 = vadd.f32 %v463_v17, %v2197_v51 }
 0x212   :  { %v465_v44 = vpop.f32.mrf.mxu1  ;;  %714 = vmatprep.mubr.f32.mxu0 %v2758_v47  ;;  %1209 = vmatpush1.msra.mxu0 %v2077_v61  ;;  %v2764_v12 = vld [vmem:[#allocation20_spill] sm:$0xff] }
 0x213   :  { %v547_v8 = vadd.f32 0.5, %v531_v19  ;;  %1660 = vtanh.f32 %v503_v43  ;;  %v466_v52 = vadd.f32 %v465_v44, %v2193_v57  ;;  %v2324_v27 = vadd.f32 %v578_v2, %v2155_v55  ;;  %1210 = vmatprep.subr.mxu0 %v2759_v22  ;;  %v2766_v22 = vld [vmem:[#allocation22_spill] sm:$0xff] }
 0x214   :  { %v1655_v46 = vpop.eup %1654  ;;  %v469_v3 = vpop.f32.mrf.mxu1  ;;  %1211 = vmatpush1.msra.mxu0 %v2760_v60  ;;  %v567_v49 = vsub.f32 %v487_v34, %v2764_v12  ;;  %v488_v42 = vmax.f32 %v464_v50, 0.0 }
 0x215   :  { %v532_v9 = vmul.f32 0.5, %v1655_v46  ;;  %v504_v23 = vmul.f32 0.5, %v466_v52  ;;  %715 = vmatmul.mubr.f32.gmra.mxu0 %v2324_v27  ;;  %v579_v61 = vmul.f32 %v563_v59, %v547_v8  ;;  %v470_v4 = vadd.f32 %v469_v3, %v2197_v51 }
 0x216   :  { %v471_v26 = vpop.f32.mrf.mxu1  ;;  %720 = vmatprep.mubr.f32.mxu0 %v2758_v47  ;;  %v568_v44 = vsub.f32 %v488_v42, %v2765_v20 }
 0x217   :  { %v548_v56 = vadd.f32 0.5, %v532_v9  ;;  %1662 = vtanh.f32 %v504_v23  ;;  %v472_v55 = vadd.f32 %v471_v26, %v2193_v57  ;;  %v2335_v36 = vadd.f32 %v579_v61, %v2162_v58 }
 0x218   :  { %v1657_v39 = vpop.eup %1656  ;;  %v489_v8 = vmax.f32 %v470_v4, 0.0 }
 0x219   :  { %v533_v28 = vmul.f32 0.5, %v1657_v39  ;;  %v505_v7 = vmul.f32 0.5, %v472_v55  ;;  %v580_v29 = vmul.f32 %v564_v25, %v548_v56  ;;  %721 = vmatmul.mubr.f32.gmra.mxu0 %v2335_v36 }
 0x21a   :  { %726 = vmatprep.mubr.f32.mxu0 %v2758_v47  ;;  %v569_v9 = vsub.f32 %v489_v8, %v2766_v22 }
 0x21b   :  { %v549_v48 = vadd.f32 0.5, %v533_v28  ;;  %1664 = vtanh.f32 %v505_v7  ;;  %v2342_v1 = vadd.f32 %v580_v29, %v2761_v62 }
 0x21c   :  { %v1659_v33 = vpop.eup %1658 }
 0x21d   :  { %v534_v58 = vmul.f32 0.5, %v1659_v33  ;;  %v581_v45 = vmul.f32 %v565_v30, %v549_v48  ;;  %727 = vmatmul.mubr.f32.gmra.mxu0 %v2342_v1 }
 0x21e   :  { %732 = vmatprep.mubr.f32.mxu0 %v2758_v47 }
 0x21f   :  { %v550_v37 = vadd.f32 0.5, %v534_v58  ;;  %v2349_v41 = vadd.f32 %v581_v45, %v2762_v31 }
 0x220   :  { %v1661_v38 = vpop.eup %1660 }
 0x221   :  { %v535_v18 = vmul.f32 0.5, %v1661_v38  ;;  %v582_v16 = vmul.f32 %v566_v35, %v550_v37  ;;  %733 = vmatmul.mubr.f32.gmra.mxu0 %v2349_v41 }
 0x222   :  { %738 = vmatprep.mubr.f32.mxu0 %v2758_v47 }
 0x223   :  { %v551_v40 = vadd.f32 0.5, %v535_v18  ;;  %v2356_v17 = vadd.f32 %v582_v16, %v2763_v14 }
 0x224   :  { %v1663_v19 = vpop.eup %1662 }
 0x225   :  { %v536_v43 = vmul.f32 0.5, %v1663_v19  ;;  %v583_v0 = vmul.f32 %v567_v49, %v551_v40  ;;  %739 = vmatmul.mubr.f32.gmra.mxu0 %v2356_v17 }
 0x226   :  { %744 = vmatprep.mubr.f32.mxu0 %v2758_v47 }
 0x227   :  { %v552_v2 = vadd.f32 0.5, %v536_v43  ;;  %v2362_v52 = vadd.f32 %v583_v0, %v2764_v12 }
 0x228   :  { %v1665_v46 = vpop.eup %1664 }
 0x229   :  { %v537_v59 = vmul.f32 0.5, %v1665_v46  ;;  %v584_v3 = vmul.f32 %v568_v44, %v552_v2  ;;  %745 = vmatmul.mubr.f32.gmra.mxu0 %v2362_v52 }
 0x22a   :  { %750 = vmatprep.mubr.f32.mxu0 %v2758_v47 }
 0x22b   :  { %v553_v23 = vadd.f32 0.5, %v537_v59  ;;  %v2368_v60 = vadd.f32 %v584_v3, %v2765_v20 }
 0x22d   :  { %v585_v62 = vmul.f32 %v569_v9, %v553_v23  ;;  %751 = vmatmul.mubr.f32.gmra.mxu0 %v2368_v60 }
 0x22e   :  { %756 = vmatprep.mubr.f32.mxu0 %v2758_v47 }
 0x22f   :  { %v2373_v25 = vadd.f32 %v585_v62, %v2766_v22 }
 0x231   :  { %757 = vmatmul.mubr.f32.gmra.mxu0 %v2373_v25 }
 0x232   :  { %1244 = vmatprep.mubr.f32.mxu0 %v2758_v47 }
 0x2b5   :  { %v668_v24 = vpop.f32.mrf.mxu0 }
 0x2b6   :  { %v669_v48 = vadd.f32 %v668_v24, %v2197_v51 }
 0x2b7   :  { %v670_v26 = vpop.f32.mrf.mxu0 }
 0x2b8   :  { %v671_v61 = vadd.f32 %v670_v26, %v2193_v57  ;;  %v763_v34 = vmax.f32 %v669_v48, 0.0 }
 0x2b9   :  { %v674_v21 = vpop.f32.mrf.mxu0 }
 0x2ba   :  { %v779_v56 = vmul.f32 0.5, %v671_v61  ;;  %v675_v38 = vadd.f32 %v674_v21, %v2197_v51  ;;  %v843_v12 = vsub.f32 %v763_v34, %v2211_v15 }
 0x2bb   :  { %v676_v55 = vpop.f32.mrf.mxu0 }
 0x2bc   :  { %1666 = vtanh.f32 %v779_v56  ;;  %v677_v39 = vadd.f32 %v676_v55, %v2193_v57  ;;  %v764_v43 = vmax.f32 %v675_v38, 0.0  ;;  %v1763_v55 = vld [vmem:[#allocation8 + $0xe8] sm:$0xff] }
 0x2bd   :  { %v680_v28 = vpop.f32.mrf.mxu0 }
 0x2be   :  { %v780_v7 = vmul.f32 0.5, %v677_v39  ;;  %v681_v0 = vadd.f32 %v680_v28, %v2197_v51  ;;  %v844_v9 = vsub.f32 %v764_v43, %v2227_v63 }
 0x2bf   :  { %v682_v29 = vpop.f32.mrf.mxu0 }
 0x2c0   :  { %1668 = vtanh.f32 %v780_v7  ;;  %v683_v31 = vadd.f32 %v682_v29, %v2193_v57  ;;  %v765_v23 = vmax.f32 %v681_v0, 0.0  ;;  %v1764_v7 = vld [vmem:[#allocation8 + $0xe0] sm:$0xff] }
 0x2c1   :  { %v686_v30 = vpop.f32.mrf.mxu0 }
 0x2c2   :  { %v781_v32 = vmul.f32 0.5, %v683_v31  ;;  %v687_v62 = vadd.f32 %v686_v30, %v2197_v51  ;;  %v845_v31 = vsub.f32 %v765_v23, %v2240_v13 }
 0x2c3   :  { %v688_v53 = vpop.f32.mrf.mxu0 }
 0x2c4   :  { %1670 = vtanh.f32 %v781_v32  ;;  %v689_v33 = vadd.f32 %v688_v53, %v2193_v57  ;;  %v766_v30 = vmax.f32 %v687_v62, 0.0 }
 0x2c5   :  { %v692_v58 = vpop.f32.mrf.mxu0 }
 0x2c6   :  { %v782_v45 = vmul.f32 0.5, %v689_v33  ;;  %v693_v32 = vadd.f32 %v692_v58, %v2197_v51  ;;  %v1765_v33 = vld [vmem:[#allocation8 + $0xd8] sm:$0xff] }
 0x2c7   :  { %v694_v14 = vpop.f32.mrf.mxu0 }
 0x2c8   :  { %1672 = vtanh.f32 %v782_v45  ;;  %v695_v37 = vadd.f32 %v694_v14, %v2193_v57  ;;  %v1766_v14 = vld [vmem:[#allocation8 + $0xd0] sm:$0xff] }
 0x2c9   :  { %v1667_v35 = vpop.eup %1666  ;;  %v2384_v18 = vpop.f32.mrf.mxu0 }
 0x2ca   :  { %v811_v50 = vmul.f32 0.5, %v1667_v35  ;;  %v783_v16 = vmul.f32 0.5, %v695_v37 }
 0x2cb   :  { %v700_v40 = vpop.f32.mrf.mxu0 }
 0x2cc   :  { %v827_v49 = vadd.f32 0.5, %v811_v50  ;;  %1674 = vtanh.f32 %v783_v16  ;;  %v701_v42 = vadd.f32 %v700_v40, %v2193_v57  ;;  %v1767_v50 = vld [vmem:[#allocation8 + $0xc8] sm:$0xff]  ;;  %v699_v40 = vadd.f32 %v2384_v18, %v2197_v51 }
 0x2cd   :  { %v1669_v4 = vpop.eup %1668  ;;  %v2389_v20 = vpop.f32.mrf.mxu0 }
 0x2ce   :  { %v859_v19 = vmul.f32 %v843_v12, %v827_v49  ;;  %v812_v44 = vmul.f32 0.5, %v1669_v4  ;;  %v784_v2 = vmul.f32 0.5, %v701_v42  ;;  %v846_v12 = vsub.f32 %v766_v30, %v2255_v6 }
 0x2cf   :  { %v706_v46 = vpop.f32.mrf.mxu0  ;;  %v767_v49 = vmax.f32 %v693_v32, 0.0  ;;  %v768_v23 = vmax.f32 %v699_v40, 0.0  ;;  %v705_v62 = vadd.f32 %v2389_v20, %v2197_v51 }
 0x2d0   :  { %v2392_v8 = vadd.f32 %v859_v19, %v2211_v15  ;;  %v828_v59 = vadd.f32 0.5, %v812_v44  ;;  %1676 = vtanh.f32 %v784_v2  ;;  %v707_v3 = vadd.f32 %v706_v46, %v2193_v57  ;;  %v1762_v15 = vld [vmem:[#allocation8 + $0xf0] sm:$0xff]  ;;  %v1769_v19 = vld [vmem:[#allocation8 + $0xb8] sm:$0xff] }
 0x2d1   :  { %v1671_v22 = vpop.eup %1670  ;;  %v2397_v24 = vpop.f32.mrf.mxu0  ;;  %v1770_v44 = vld [vmem:[#allocation8 + $0xb0] sm:$0xff]  ;;  %v848_v30 = vsub.f32 %v768_v23, %v2285_v11  ;;  %v769_v32 = vmax.f32 %v705_v62, 0.0 }
 0x2d2   :  { %956 = vmatmul.mubr.f32.vlgmr.msra.gmra.mxu1 %v2392_v8  ;;  %v813_v26 = vmul.f32 0.5, %v1671_v22  ;;  %v785_v61 = vmul.f32 0.5, %v707_v3  ;;  %v860_v21 = vmul.f32 %v844_v9, %v828_v59  ;;  %v1771_v59 = vld [vmem:[#allocation8 + $0xa8] sm:$0xff]  ;;  %v847_v9 = vsub.f32 %v767_v49, %v2270_v10 }
 0x2d3   :  { %961 = vmatprep.mubr.f32.mxu1 %v2758_v47  ;;  %1608 = vmatpush1.msra.mxu1 %v1762_v15  ;;  %v712_v56 = vpop.f32.mrf.mxu0  ;;  %v1773_v15 = vld [vmem:[#allocation8 + $0x98] sm:$0xff]  ;;  %v849_v49 = vsub.f32 %v769_v32, %v2298_v54 }
 0x2d4   :  { %1593 = vmatprep.subr.mxu1 %v1763_v55  ;;  %v829_v39 = vadd.f32 0.5, %v813_v26  ;;  %1678 = vtanh.f32 %v785_v61  ;;  %v713_v28 = vadd.f32 %v712_v56, %v2193_v57  ;;  %v2407_v53 = vadd.f32 %v860_v21, %v2227_v63  ;;  %v1768_v63 = vld [vmem:[#allocation8 + $0xc0] sm:$0xff]  ;;  %v1774_v55 = vld [vmem:[#allocation8 + $0x90] sm:$0xff] }
 0x2d5   :  { %1609 = vmatpush1.msra.mxu1 %v1764_v7  ;;  %v1673_v29 = vpop.eup %1672  ;;  %v2404_v48 = vpop.f32.mrf.mxu0  ;;  %v1775_v7 = vld [vmem:[#allocation8 + $0x88] sm:$0xff] }
 0x2d6   :  { %1594 = vmatprep.subr.mxu1 %v1765_v33  ;;  %v814_v45 = vmul.f32 0.5, %v1673_v29  ;;  %v786_v34 = vmul.f32 0.5, %v713_v28  ;;  %962 = vmatmul.mubr.f32.gmra.mxu1 %v2407_v53  ;;  %v861_v37 = vmul.f32 %v845_v31, %v829_v39  ;;  %v711_v33 = vadd.f32 %v2397_v24, %v2197_v51 }
 0x2d7   :  { %1610 = vmatpush1.msra.mxu1 %v1766_v14  ;;  %v718_v35 = vpop.f32.mrf.mxu0  ;;  %967 = vmatprep.mubr.f32.mxu1 %v2758_v47  ;;  %v1777_v14 = vld [vmem:[#allocation8 + $0x78] sm:$0xff] }
 0x2d8   :  { %1595 = vmatprep.subr.mxu1 %v1767_v50  ;;  %v830_v38 = vadd.f32 0.5, %v814_v45  ;;  %1680 = vtanh.f32 %v786_v34  ;;  %v719_v58 = vadd.f32 %v718_v35, %v2193_v57  ;;  %v2418_v4 = vadd.f32 %v861_v37, %v2240_v13  ;;  %v1772_v13 = vld [vmem:[#allocation8 + $0xa0] sm:$0xff]  ;;  %v1778_v50 = vld [vmem:[#allocation8 + $0x70] sm:$0xff] }
 0x2d9   :  { %1611 = vmatpush1.msra.mxu1 %v1768_v63  ;;  %v1675_v16 = vpop.eup %1674  ;;  %v2415_v42 = vpop.f32.mrf.mxu0  ;;  %v1779_v63 = vld [vmem:[#allocation8 + $0x68] sm:$0xff]  ;;  %v770_v40 = vmax.f32 %v711_v33, 0.0 }
 0x2da   :  { %1596 = vmatprep.subr.mxu1 %v1769_v19  ;;  %v815_v43 = vmul.f32 0.5, %v1675_v16  ;;  %v787_v0 = vmul.f32 0.5, %v719_v58  ;;  %968 = vmatmul.mubr.f32.gmra.mxu1 %v2418_v4  ;;  %v862_v46 = vmul.f32 %v846_v12, %v830_v38  ;;  %v717_v19 = vadd.f32 %v2404_v48, %v2197_v51 }
 0x2db   :  { %1612 = vmatpush1.msra.mxu1 %v1770_v44  ;;  %v724_v2 = vpop.f32.mrf.mxu0  ;;  %973 = vmatprep.mubr.f32.mxu1 %v2758_v47  ;;  %v1781_v44 = vld [vmem:[#allocation8 + $0x58] sm:$0xff]  ;;  %v850_v23 = vsub.f32 %v770_v40, %v2311_v5  ;;  %v1792_v40 = vld [vmem:[#allocation8] sm:$0xff] }
 0x2dc   :  { %1597 = vmatprep.subr.mxu1 %v1771_v59  ;;  %v831_v3 = vadd.f32 0.5, %v815_v43  ;;  %1682 = vtanh.f32 %v787_v0  ;;  %v725_v18 = vadd.f32 %v724_v2, %v2193_v57  ;;  %v2429_v61 = vadd.f32 %v862_v46, %v2255_v6  ;;  %v1776_v6 = vld [vmem:[#allocation8 + $0x80] sm:$0xff]  ;;  %v1782_v59 = vld [vmem:[#allocation8 + $0x50] sm:$0xff] }
 0x2dd   :  { %1613 = vmatpush1.msra.mxu1 %v1772_v13  ;;  %v1677_v22 = vpop.eup %1676  ;;  %v2426_v26 = vpop.f32.mrf.mxu0  ;;  %v1783_v13 = vld [vmem:[#allocation8 + $0x48] sm:$0xff]  ;;  %v771_v62 = vmax.f32 %v717_v19, 0.0 }
 0x2de   :  { %1598 = vmatprep.subr.mxu1 %v1773_v15  ;;  %v816_v56 = vmul.f32 0.5, %v1677_v22  ;;  %v788_v21 = vmul.f32 0.5, %v725_v18  ;;  %974 = vmatmul.mubr.f32.gmra.mxu1 %v2429_v61  ;;  %v863_v28 = vmul.f32 %v847_v9, %v831_v3  ;;  %v723_v15 = vadd.f32 %v2415_v42, %v2197_v51 }
 0x2df   :  { %1614 = vmatpush1.msra.mxu1 %v1774_v55  ;;  %v730_v39 = vpop.f32.mrf.mxu0  ;;  %979 = vmatprep.mubr.f32.mxu1 %v2758_v47  ;;  %v1785_v55 = vld [vmem:[#allocation8 + $0x38] sm:$0xff]  ;;  %v851_v33 = vsub.f32 %v771_v62, %v2324_v27 }
 0x2e0   :  { %1599 = vmatprep.subr.mxu1 %v1775_v7  ;;  %v832_v29 = vadd.f32 0.5, %v816_v56  ;;  %1684 = vtanh.f32 %v788_v21  ;;  %v731_v20 = vadd.f32 %v730_v39, %v2193_v57  ;;  %v2440_v34 = vadd.f32 %v863_v28, %v2270_v10  ;;  %v1780_v10 = vld [vmem:[#allocation8 + $0x60] sm:$0xff]  ;;  %v1786_v7 = vld [vmem:[#allocation8 + $0x30] sm:$0xff] }
 0x2e1   :  { %1615 = vmatpush1.msra.mxu1 %v1776_v6  ;;  %v1679_v31 = vpop.eup %1678  ;;  %v2437_v45 = vpop.f32.mrf.mxu0 }
 0x2e2   :  { %1600 = vmatprep.subr.mxu1 %v1777_v14  ;;  %v817_v35 = vmul.f32 0.5, %v1679_v31  ;;  %v789_v37 = vmul.f32 0.5, %v731_v20  ;;  %980 = vmatmul.mubr.f32.gmra.mxu1 %v2440_v34  ;;  %v864_v58 = vmul.f32 %v848_v30, %v832_v29  ;;  %v729_v29 = vadd.f32 %v2426_v26, %v2197_v51  ;;  %v1787_v31 = vld [vmem:[#allocation8 + $0x28] sm:$0xff]  ;;  %v1788_v30 = vld [vmem:[#allocation8 + $0x20] sm:$0xff] }
 0x2e3   :  { %1616 = vmatpush1.msra.mxu1 %v1778_v50  ;;  %v736_v38 = vpop.f32.mrf.mxu0  ;;  %985 = vmatprep.mubr.f32.mxu1 %v2758_v47  ;;  %v772_v14 = vmax.f32 %v723_v15, 0.0 }
 0x2e4   :  { %1601 = vmatprep.subr.mxu1 %v1779_v63  ;;  %v833_v16 = vadd.f32 0.5, %v817_v35  ;;  %1686 = vtanh.f32 %v789_v37  ;;  %v737_v24 = vadd.f32 %v736_v38, %v2193_v57  ;;  %v2451_v0 = vadd.f32 %v864_v58, %v2285_v11  ;;  %v1784_v11 = vld [vmem:[#allocation8 + $0x40] sm:$0xff]  ;;  %v1789_v37 = vld [vmem:[#allocation8 + $0x18] sm:$0xff]  ;;  %v1790_v58 = vld [vmem:[#allocation8 + $0x10] sm:$0xff] }
 0x2e5   :  { %1617 = vmatpush1.msra.mxu1 %v1780_v10  ;;  %v1681_v12 = vpop.eup %1680  ;;  %v2448_v43 = vpop.f32.mrf.mxu0  ;;  %v773_v63 = vmax.f32 %v729_v29, 0.0 }
 0x2e6   :  { %1602 = vmatprep.subr.mxu1 %v1781_v44  ;;  %v818_v2 = vmul.f32 0.5, %v1681_v12  ;;  %v790_v46 = vmul.f32 0.5, %v737_v24  ;;  %986 = vmatmul.mubr.f32.gmra.mxu1 %v2451_v0  ;;  %v865_v18 = vmul.f32 %v849_v49, %v833_v16  ;;  %v735_v16 = vadd.f32 %v2437_v45, %v2197_v51  ;;  %v1791_v12 = vld [vmem:[#allocation8 + $0x8] sm:$0xff] }
 0x2e7   :  { %1618 = vmatpush1.msra.mxu1 %v1782_v59  ;;  %v742_v3 = vpop.f32.mrf.mxu0  ;;  %991 = vmatprep.mubr.f32.mxu1 %v2758_v47  ;;  %v852_v44 = vsub.f32 %v772_v14, %v2335_v36 }
 0x2e8   :  { %1603 = vmatprep.subr.mxu1 %v1783_v13  ;;  %v834_v22 = vadd.f32 0.5, %v818_v2  ;;  %1688 = vtanh.f32 %v790_v46  ;;  %v743_v48 = vadd.f32 %v742_v3, %v2193_v57  ;;  %v2462_v21 = vadd.f32 %v865_v18, %v2298_v54 }
 0x2e9   :  { %1619 = vmatpush1.msra.mxu1 %v1784_v11  ;;  %v1683_v9 = vpop.eup %1682  ;;  %v2459_v56 = vpop.f32.mrf.mxu0  ;;  %v853_v3 = vsub.f32 %v773_v63, %v2342_v1  ;;  %v774_v18 = vmax.f32 %v735_v16, 0.0  ;;  %v741_v11 = vadd.f32 %v2448_v43, %v2197_v51 }
 0x2ea   :  { %1604 = vmatprep.subr.mxu1 %v1785_v55  ;;  %v819_v39 = vmul.f32 0.5, %v1683_v9  ;;  %v791_v28 = vmul.f32 0.5, %v743_v48  ;;  %992 = vmatmul.mubr.f32.gmra.mxu1 %v2462_v21  ;;  %v866_v6 = vmul.f32 %v850_v23, %v834_v22 }
 0x2eb   :  { %1620 = vmatpush1.msra.mxu1 %v1786_v7  ;;  %v748_v20 = vpop.f32.mrf.mxu0  ;;  %997 = vmatprep.mubr.f32.mxu1 %v2758_v47  ;;  %v775_v7 = vmax.f32 %v741_v11, 0.0 }
 0x2ec   :  { %1605 = vmatprep.subr.mxu1 %v1787_v31  ;;  %v835_v42 = vadd.f32 0.5, %v819_v39  ;;  %1690 = vtanh.f32 %v791_v28  ;;  %v749_v54 = vadd.f32 %v748_v20, %v2193_v57  ;;  %v2471_v26 = vadd.f32 %v866_v6, %v2311_v5 }
 0x2ed   :  { %1621 = vmatpush1.msra.mxu1 %v1788_v30  ;;  %v1685_v32 = vpop.eup %1684  ;;  %v752_v35 = vpop.f32.mrf.mxu0  ;;  %v854_v39 = vsub.f32 %v774_v18, %v2349_v41  ;;  %v747_v28 = vadd.f32 %v2459_v56, %v2197_v51 }
 0x2ee   :  { %1606 = vmatprep.subr.mxu1 %v1789_v37  ;;  %v820_v50 = vmul.f32 0.5, %v1685_v32  ;;  %v792_v38 = vmul.f32 0.5, %v749_v54  ;;  %998 = vmatmul.mubr.f32.gmra.mxu1 %v2471_v26  ;;  %v867_v10 = vmul.f32 %v851_v33, %v835_v42  ;;  %v855_v42 = vsub.f32 %v775_v7, %v2356_v17 }
 0x2ef   :  { %1622 = vmatpush1.msra.mxu1 %v1790_v58  ;;  %v754_v24 = vpop.f32.mrf.mxu0  ;;  %1003 = vmatprep.mubr.f32.mxu1 %v2758_v47  ;;  %v776_v31 = vmax.f32 %v747_v28, 0.0  ;;  %v753_v56 = vadd.f32 %v752_v35, %v2197_v51 }
 0x2f0   :  { %1607 = vmatprep.subr.mxu1 %v1791_v12  ;;  %v836_v49 = vadd.f32 0.5, %v820_v50  ;;  %1692 = vtanh.f32 %v792_v38  ;;  %v755_v5 = vadd.f32 %v754_v24, %v2193_v57  ;;  %v2480_v45 = vadd.f32 %v867_v10, %v2324_v27 }
 0x2f1   :  { %1623 = vmatpush1.msra.mxu1 %v1792_v40  ;;  %v1687_v19 = vpop.eup %1686  ;;  %v758_v2 = vpop.f32.mrf.mxu0  ;;  %v856_v14 = vsub.f32 %v776_v31, %v2362_v52  ;;  %v777_v50 = vmax.f32 %v753_v56, 0.0 }
 0x2f2   :  { %v821_v46 = vmul.f32 0.5, %v1687_v19  ;;  %v793_v59 = vmul.f32 0.5, %v755_v5  ;;  %1004 = vmatmul.mubr.f32.gmra.mxu1 %v2480_v45  ;;  %v868_v22 = vmul.f32 %v852_v44, %v836_v49  ;;  %v759_v38 = vadd.f32 %v758_v2, %v2197_v51 }
 0x2f3   :  { %v760_v13 = vpop.f32.mrf.mxu0  ;;  %1009 = vmatprep.mubr.f32.mxu1 %v2758_v47  ;;  %v857_v16 = vsub.f32 %v777_v50, %v2368_v60 }
 0x2f4   :  { %v837_v48 = vadd.f32 0.5, %v821_v46  ;;  %1694 = vtanh.f32 %v793_v59  ;;  %v761_v9 = vadd.f32 %v760_v13, %v2193_v57  ;;  %v2489_v23 = vadd.f32 %v868_v22, %v2335_v36 }
 0x2f5   :  { %v1689_v27 = vpop.eup %1688  ;;  %v778_v10 = vmax.f32 %v759_v38, 0.0 }
 0x2f6   :  { %v822_v62 = vmul.f32 0.5, %v1689_v27  ;;  %v794_v15 = vmul.f32 0.5, %v761_v9  ;;  %v869_v55 = vmul.f32 %v853_v3, %v837_v48  ;;  %1010 = vmatmul.mubr.f32.gmra.mxu1 %v2489_v23 }
 0x2f7   :  { %1015 = vmatprep.mubr.f32.mxu1 %v2758_v47 }
 0x2f8   :  { %v838_v43 = vadd.f32 0.5, %v822_v62  ;;  %1696 = vtanh.f32 %v794_v15  ;;  %v2497_v29 = vadd.f32 %v869_v55, %v2342_v1 }
 0x2f9   :  { %v1691_v36 = vpop.eup %1690 }
 0x2fa   :  { %v823_v20 = vmul.f32 0.5, %v1691_v36  ;;  %v870_v6 = vmul.f32 %v854_v39, %v838_v43  ;;  %1016 = vmatmul.mubr.f32.gmra.mxu1 %v2497_v29 }
 0x2fb   :  { %1021 = vmatprep.mubr.f32.mxu1 %v2758_v47 }
 0x2fc   :  { %v839_v54 = vadd.f32 0.5, %v823_v20  ;;  %v2504_v30 = vadd.f32 %v870_v6, %v2349_v41 }
 0x2fd   :  { %v1693_v32 = vpop.eup %1692 }
 0x2fe   :  { %v824_v33 = vmul.f32 0.5, %v1693_v32  ;;  %v871_v1 = vmul.f32 %v855_v42, %v839_v54  ;;  %1022 = vmatmul.mubr.f32.gmra.mxu1 %v2504_v30 }
 0x2ff   :  { %1027 = vmatprep.mubr.f32.mxu1 %v2758_v47 }
 0x300   :  { %v840_v37 = vadd.f32 0.5, %v824_v33  ;;  %v2511_v35 = vadd.f32 %v871_v1, %v2356_v17  ;;  %v858_v17 = vsub.f32 %v778_v10, %v2373_v25 }
 0x301   :  { %v1695_v58 = vpop.eup %1694 }
 0x302   :  { %v825_v63 = vmul.f32 0.5, %v1695_v58  ;;  %v872_v41 = vmul.f32 %v856_v14, %v840_v37  ;;  %1028 = vmatmul.mubr.f32.gmra.mxu1 %v2511_v35 }
 0x303   :  { %1033 = vmatprep.mubr.f32.mxu1 %v2758_v47 }
 0x304   :  { %v841_v24 = vadd.f32 0.5, %v825_v63  ;;  %v2517_v12 = vadd.f32 %v872_v41, %v2362_v52 }
 0x305   :  { %v1697_v49 = vpop.eup %1696 }
 0x306   :  { %v826_v5 = vmul.f32 0.5, %v1697_v49  ;;  %v873_v40 = vmul.f32 %v857_v16, %v841_v24  ;;  %1034 = vmatmul.mubr.f32.gmra.mxu1 %v2517_v12 }
 0x307   :  { %1039 = vmatprep.mubr.f32.mxu1 %v2758_v47 }
 0x308   :  { %v842_v19 = vadd.f32 0.5, %v826_v5  ;;  %v2523_v44 = vadd.f32 %v873_v40, %v2368_v60 }
 0x30a   :  { %v874_v2 = vmul.f32 %v858_v17, %v842_v19  ;;  %1040 = vmatmul.mubr.f32.gmra.mxu1 %v2523_v44 }
 0x30b   :  { %1045 = vmatprep.mubr.f32.mxu1 %v2758_v47 }
 0x30c   :  { %v2528_v52 = vadd.f32 %v874_v2, %v2373_v25 }
 0x30e   :  { %1046 = vmatmul.mubr.f32.gmra.mxu1 %v2528_v52 }
 0x30f   :  { %1316 = vmatprep.mubr.f32.mxu1 %v2758_v47 }
 0x392   :  { %v957_v46 = vpop.f32.mrf.mxu1 }
 0x393   :  { %v958_v62 = vadd.f32 %v957_v46, %v2197_v51 }
 0x394   :  { %v959_v59 = vpop.f32.mrf.mxu1 }
 0x395   :  { %v960_v3 = vadd.f32 %v959_v59, %v2193_v57  ;;  %v1052_v43 = vmax.f32 %v958_v62, 0.0 }
 0x396   :  { %v963_v13 = vpop.f32.mrf.mxu1 }
 0x397   :  { %v1068_v18 = vmul.f32 0.5, %v960_v3  ;;  %v964_v31 = vadd.f32 %v963_v13, %v2197_v51  ;;  %v1132_v56 = vsub.f32 %v1052_v43, %v2392_v8 }
 0x398   :  { %v965_v60 = vpop.f32.mrf.mxu1 }
 0x399   :  { %1698 = vtanh.f32 %v1068_v18  ;;  %v966_v22 = vadd.f32 %v965_v60, %v2193_v57  ;;  %v1053_v37 = vmax.f32 %v964_v31, 0.0 }
 0x39a   :  { %v969_v48 = vpop.f32.mrf.mxu1 }
 0x39b   :  { %v1069_v11 = vmul.f32 0.5, %v966_v22  ;;  %v970_v58 = vadd.f32 %v969_v48, %v2197_v51  ;;  %v1133_v49 = vsub.f32 %v1053_v37, %v2407_v53 }
 0x39c   :  { %v971_v9 = vpop.f32.mrf.mxu1 }
 0x39d   :  { %1700 = vtanh.f32 %v1069_v11  ;;  %v972_v25 = vadd.f32 %v971_v9, %v2193_v57  ;;  %v1054_v19 = vmax.f32 %v970_v58, 0.0 }
 0x39e   :  { %v975_v27 = vpop.f32.mrf.mxu1 }
 0x39f   :  { %v1070_v15 = vmul.f32 0.5, %v972_v25  ;;  %v976_v2 = vadd.f32 %v975_v27, %v2197_v51  ;;  %v1134_v48 = vsub.f32 %v1054_v19, %v2418_v4 }
 0x3a0   :  { %v977_v55 = vpop.f32.mrf.mxu1 }
 0x3a1   :  { %1702 = vtanh.f32 %v1070_v15  ;;  %v978_v39 = vadd.f32 %v977_v55, %v2193_v57  ;;  %v1055_v11 = vmax.f32 %v976_v2, 0.0 }
 0x3a2   :  { %v981_v28 = vpop.f32.mrf.mxu1 }
 0x3a3   :  { %v1071_v7 = vmul.f32 0.5, %v978_v39  ;;  %v982_v9 = vadd.f32 %v981_v28, %v2197_v51 }
 0x3a4   :  { %v983_v20 = vpop.f32.mrf.mxu1 }
 0x3a5   :  { %1704 = vtanh.f32 %v1071_v7  ;;  %v984_v42 = vadd.f32 %v983_v20, %v2193_v57  ;;  %v1135_v20 = vsub.f32 %v1055_v11, %v2429_v61  ;;  %v1056_v28 = vmax.f32 %v982_v9, 0.0 }
 0x3a6   :  { %v1699_v36 = vpop.eup %1698  ;;  %v987_v54 = vpop.f32.mrf.mxu1 }
 0x3a7   :  { %v1100_v6 = vmul.f32 0.5, %v1699_v36  ;;  %v1072_v33 = vmul.f32 0.5, %v984_v42 }
 0x3a8   :  { %v989_v1 = vpop.f32.mrf.mxu1 }
 0x3a9   :  { %v1116_v32 = vadd.f32 0.5, %v1100_v6  ;;  %1706 = vtanh.f32 %v1072_v33  ;;  %v990_v50 = vadd.f32 %v989_v1, %v2193_v57  ;;  %v988_v6 = vadd.f32 %v987_v54, %v2197_v51 }
 0x3aa   :  { %v1701_v38 = vpop.eup %1700  ;;  %v993_v63 = vpop.f32.mrf.mxu1 }
 0x3ab   :  { %v1148_v14 = vmul.f32 %v1132_v56, %v1116_v32  ;;  %v1101_v16 = vmul.f32 0.5, %v1701_v38  ;;  %v1073_v24 = vmul.f32 0.5, %v990_v50  ;;  %v1136_v50 = vsub.f32 %v1056_v28, %v2440_v34 }
 0x3ac   :  { %v995_v10 = vpop.f32.mrf.mxu1  ;;  %v1057_v54 = vmax.f32 %v988_v6, 0.0  ;;  %v994_v38 = vadd.f32 %v993_v63, %v2197_v51 }
 0x3ad   :  { %v2543_v41 = vadd.f32 %v1148_v14, %v2392_v8  ;;  %v1117_v5 = vadd.f32 0.5, %v1101_v16  ;;  %1708 = vtanh.f32 %v1073_v24  ;;  %v996_v40 = vadd.f32 %v995_v10, %v2193_v57 }
 0x3ae   :  { %v1703_v17 = vpop.eup %1702  ;;  %v999_v46 = vpop.f32.mrf.mxu1  ;;  %v1137_v19 = vsub.f32 %v1057_v54, %v2451_v0  ;;  %v1058_v63 = vmax.f32 %v994_v38, 0.0 }
 0x3af   :  { %1245 = vmatmul.mubr.f32.vlgmr.msra.gmra.mxu0 %v2543_v41  ;;  %v1102_v8 = vmul.f32 0.5, %v1703_v17  ;;  %v1074_v59 = vmul.f32 0.5, %v996_v40  ;;  %v1149_v3 = vmul.f32 %v1133_v49, %v1117_v5  ;;  %v1000_v2 = vadd.f32 %v999_v46, %v2197_v51 }
 0x3b0   :  { %1250 = vmatprep.mubr.f32.mxu0 %v2758_v47  ;;  %v1001_v18 = vpop.f32.mrf.mxu1  ;;  %v1138_v11 = vsub.f32 %v1058_v63, %v2462_v21 }
 0x3b1   :  { %v1118_v13 = vadd.f32 0.5, %v1102_v8  ;;  %1710 = vtanh.f32 %v1074_v59  ;;  %v1002_v60 = vadd.f32 %v1001_v18, %v2193_v57  ;;  %v2554_v27 = vadd.f32 %v1149_v3, %v2407_v53 }
 0x3b2   :  { %v1705_v22 = vpop.eup %1704  ;;  %v1005_v25 = vpop.f32.mrf.mxu1  ;;  %v1059_v46 = vmax.f32 %v1000_v2, 0.0 }
 0x3b3   :  { %v1103_v62 = vmul.f32 0.5, %v1705_v22  ;;  %v1075_v15 = vmul.f32 0.5, %v1002_v60  ;;  %1251 = vmatmul.mubr.f32.gmra.mxu0 %v2554_v27  ;;  %v1150_v39 = vmul.f32 %v1134_v48, %v1118_v13  ;;  %v1006_v9 = vadd.f32 %v1005_v25, %v2197_v51 }
 0x3b4   :  { %v1007_v55 = vpop.f32.mrf.mxu1  ;;  %1256 = vmatprep.mubr.f32.mxu0 %v2758_v47  ;;  %v1139_v28 = vsub.f32 %v1059_v46, %v2471_v26 }
 0x3b5   :  { %v1119_v43 = vadd.f32 0.5, %v1103_v62  ;;  %1712 = vtanh.f32 %v1075_v15  ;;  %v1008_v7 = vadd.f32 %v1007_v55, %v2193_v57  ;;  %v2562_v31 = vadd.f32 %v1150_v39, %v2418_v4 }
 0x3b6   :  { %v1707_v36 = vpop.eup %1706  ;;  %v1011_v53 = vpop.f32.mrf.mxu1  ;;  %v1060_v25 = vmax.f32 %v1006_v9, 0.0 }
 0x3b7   :  { %v1104_v42 = vmul.f32 0.5, %v1707_v36  ;;  %v1076_v56 = vmul.f32 0.5, %v1008_v7  ;;  %1257 = vmatmul.mubr.f32.gmra.mxu0 %v2562_v31  ;;  %v1151_v33 = vmul.f32 %v1135_v20, %v1119_v43  ;;  %v1012_v6 = vadd.f32 %v1011_v53, %v2197_v51 }
 0x3b8   :  { %v1013_v32 = vpop.f32.mrf.mxu1  ;;  %1262 = vmatprep.mubr.f32.mxu0 %v2758_v47  ;;  %v1140_v53 = vsub.f32 %v1060_v25, %v2480_v45 }
 0x3b9   :  { %v1120_v1 = vadd.f32 0.5, %v1104_v42  ;;  %1714 = vtanh.f32 %v1076_v56  ;;  %v1014_v14 = vadd.f32 %v1013_v32, %v2193_v57  ;;  %v2570_v58 = vadd.f32 %v1151_v33, %v2429_v61 }
 0x3ba   :  { %v1709_v37 = vpop.eup %1708  ;;  %v1017_v4 = vpop.f32.mrf.mxu1  ;;  %v1061_v38 = vmax.f32 %v1012_v6, 0.0 }
 0x3bb   :  { %v1105_v16 = vmul.f32 0.5, %v1709_v37  ;;  %v1077_v24 = vmul.f32 0.5, %v1014_v14  ;;  %1263 = vmatmul.mubr.f32.gmra.mxu0 %v2570_v58  ;;  %v1152_v49 = vmul.f32 %v1136_v50, %v1120_v1  ;;  %v1018_v33 = vadd.f32 %v1017_v4, %v2197_v51 }
 0x3bc   :  { %v1019_v10 = vpop.f32.mrf.mxu1  ;;  %1268 = vmatprep.mubr.f32.mxu0 %v2758_v47  ;;  %v1141_v2 = vsub.f32 %v1061_v38, %v2489_v23 }
 0x3bd   :  { %v1121_v5 = vadd.f32 0.5, %v1105_v16  ;;  %1716 = vtanh.f32 %v1077_v24  ;;  %v1020_v40 = vadd.f32 %v1019_v10, %v2193_v57  ;;  %v2578_v8 = vadd.f32 %v1152_v49, %v2440_v34 }
 0x3be   :  { %v1711_v17 = vpop.eup %1710  ;;  %v1023_v61 = vpop.f32.mrf.mxu1  ;;  %v1062_v10 = vmax.f32 %v1018_v33, 0.0 }
 0x3bf   :  { %v1106_v59 = vmul.f32 0.5, %v1711_v17  ;;  %v1078_v3 = vmul.f32 0.5, %v1020_v40  ;;  %1269 = vmatmul.mubr.f32.gmra.mxu0 %v2578_v8  ;;  %v1153_v13 = vmul.f32 %v1137_v19, %v1121_v5  ;;  %v1024_v49 = vadd.f32 %v1023_v61, %v2197_v51 }
 0x3c0   :  { %v1025_v18 = vpop.f32.mrf.mxu1  ;;  %1274 = vmatprep.mubr.f32.mxu0 %v2758_v47  ;;  %v1142_v61 = vsub.f32 %v1062_v10, %v2497_v29 }
 0x3c1   :  { %v1122_v60 = vadd.f32 0.5, %v1106_v59  ;;  %1718 = vtanh.f32 %v1078_v3  ;;  %v1026_v22 = vadd.f32 %v1025_v18, %v2193_v57  ;;  %v2586_v62 = vadd.f32 %v1153_v13, %v2451_v0 }
 0x3c2   :  { %v1713_v48 = vpop.eup %1712  ;;  %v1029_v34 = vpop.f32.mrf.mxu1  ;;  %v1063_v13 = vmax.f32 %v1024_v49, 0.0 }
 0x3c3   :  { %v1107_v15 = vmul.f32 0.5, %v1713_v48  ;;  %v1079_v55 = vmul.f32 0.5, %v1026_v22  ;;  %1275 = vmatmul.mubr.f32.gmra.mxu0 %v2586_v62  ;;  %v1154_v43 = vmul.f32 %v1138_v11, %v1122_v60  ;;  %v1030_v11 = vadd.f32 %v1029_v34, %v2197_v51 }
 0x3c4   :  { %v1031_v39 = vpop.f32.mrf.mxu1  ;;  %1280 = vmatprep.mubr.f32.mxu0 %v2758_v47 }
 0x3c5   :  { %v1123_v7 = vadd.f32 0.5, %v1107_v15  ;;  %1720 = vtanh.f32 %v1079_v55  ;;  %v1032_v36 = vadd.f32 %v1031_v39, %v2193_v57  ;;  %v2594_v42 = vadd.f32 %v1154_v43, %v2462_v21 }
 0x3c6   :  { %v1715_v20 = vpop.eup %1714  ;;  %v1035_v0 = vpop.f32.mrf.mxu1  ;;  %v1143_v43 = vsub.f32 %v1063_v13, %v2504_v30  ;;  %v1064_v34 = vmax.f32 %v1030_v11, 0.0 }
 0x3c7   :  { %v1108_v56 = vmul.f32 0.5, %v1715_v20  ;;  %v1080_v32 = vmul.f32 0.5, %v1032_v36  ;;  %1281 = vmatmul.mubr.f32.gmra.mxu0 %v2594_v42  ;;  %v1155_v14 = vmul.f32 %v1139_v28, %v1123_v7  ;;  %v1036_v7 = vadd.f32 %v1035_v0, %v2197_v51 }
 0x3c8   :  { %v1037_v1 = vpop.f32.mrf.mxu1  ;;  %1286 = vmatprep.mubr.f32.mxu0 %v2758_v47 }
 0x3c9   :  { %v1124_v37 = vadd.f32 0.5, %v1108_v56  ;;  %1722 = vtanh.f32 %v1080_v32  ;;  %v1038_v50 = vadd.f32 %v1037_v1, %v2193_v57  ;;  %v2602_v16 = vadd.f32 %v1155_v14, %v2471_v26 }
 0x3ca   :  { %v1717_v54 = vpop.eup %1716  ;;  %v1041_v21 = vpop.f32.mrf.mxu1  ;;  %v1065_v6 = vmax.f32 %v1036_v7, 0.0  ;;  %v1144_v56 = vsub.f32 %v1064_v34, %v2511_v35 }
 0x3cb   :  { %v1109_v24 = vmul.f32 0.5, %v1717_v54  ;;  %v1081_v4 = vmul.f32 0.5, %v1038_v50  ;;  %1287 = vmatmul.mubr.f32.gmra.mxu0 %v2602_v16  ;;  %v1156_v40 = vmul.f32 %v1140_v53, %v1124_v37  ;;  %v1042_v0 = vadd.f32 %v1041_v21, %v2197_v51 }
 0x3cc   :  { %v1043_v5 = vpop.f32.mrf.mxu1  ;;  %1292 = vmatprep.mubr.f32.mxu0 %v2758_v47  ;;  %v1145_v37 = vsub.f32 %v1065_v6, %v2517_v12 }
 0x3cd   :  { %v1125_v17 = vadd.f32 0.5, %v1109_v24  ;;  %1724 = vtanh.f32 %v1081_v4  ;;  %v1044_v19 = vadd.f32 %v1043_v5, %v2193_v57  ;;  %v2610_v59 = vadd.f32 %v1156_v40, %v2480_v45 }
 0x3ce   :  { %v1719_v63 = vpop.eup %1718  ;;  %v1047_v26 = vpop.f32.mrf.mxu1  ;;  %v1066_v53 = vmax.f32 %v1042_v0, 0.0 }
 0x3cf   :  { %v1110_v3 = vmul.f32 0.5, %v1719_v63  ;;  %v1082_v18 = vmul.f32 0.5, %v1044_v19  ;;  %1293 = vmatmul.mubr.f32.gmra.mxu0 %v2610_v59  ;;  %v1157_v22 = vmul.f32 %v1141_v2, %v1125_v17  ;;  %v1048_v38 = vadd.f32 %v1047_v26, %v2197_v51 }
 0x3d0   :  { %v1049_v60 = vpop.f32.mrf.mxu1  ;;  %1298 = vmatprep.mubr.f32.mxu0 %v2758_v47  ;;  %v1146_v4 = vsub.f32 %v1066_v53, %v2523_v44 }
 0x3d1   :  { %v1126_v48 = vadd.f32 0.5, %v1110_v3  ;;  %1726 = vtanh.f32 %v1082_v18  ;;  %v1050_v46 = vadd.f32 %v1049_v60, %v2193_v57  ;;  %v2618_v45 = vadd.f32 %v1157_v22, %v2489_v23 }
 0x3d2   :  { %v1721_v9 = vpop.eup %1720  ;;  %v1067_v49 = vmax.f32 %v1048_v38, 0.0 }
 0x3d3   :  { %v1111_v15 = vmul.f32 0.5, %v1721_v9  ;;  %v1083_v55 = vmul.f32 0.5, %v1050_v46  ;;  %v1158_v39 = vmul.f32 %v1142_v61, %v1126_v48  ;;  %1299 = vmatmul.mubr.f32.gmra.mxu0 %v2618_v45 }
 0x3d4   :  { %1304 = vmatprep.mubr.f32.mxu0 %v2758_v47  ;;  %v1147_v19 = vsub.f32 %v1067_v49, %v2528_v52 }
 0x3d5   :  { %v1127_v36 = vadd.f32 0.5, %v1111_v15  ;;  %1728 = vtanh.f32 %v1083_v55  ;;  %v2625_v20 = vadd.f32 %v1158_v39, %v2497_v29 }
 0x3d6   :  { %v1723_v28 = vpop.eup %1722 }
 0x3d7   :  { %v1112_v23 = vmul.f32 0.5, %v1723_v28  ;;  %v1159_v25 = vmul.f32 %v1143_v43, %v1127_v36  ;;  %1305 = vmatmul.mubr.f32.gmra.mxu0 %v2625_v20 }
 0x3d8   :  { %1310 = vmatprep.mubr.f32.mxu0 %v2758_v47 }
 0x3d9   :  { %v1128_v32 = vadd.f32 0.5, %v1112_v23  ;;  %v2632_v33 = vadd.f32 %v1159_v25, %v2504_v30 }
 0x3da   :  { %v1725_v1 = vpop.eup %1724 }
 0x3db   :  { %v1160_v14 = vmul.f32 %v1144_v56, %v1128_v32  ;;  %v1113_v29 = vmul.f32 0.5, %v1725_v1  ;;  %1311 = vmatmul.mubr.f32.gmra.mxu0 %v2632_v33 }
 0x3dd   :  { %v2637_v50 = vadd.f32 %v1160_v14, %v2511_v35  ;;  %v1129_v54 = vadd.f32 0.5, %v1113_v29 }
 0x3de   :  { %v1727_v21 = vpop.eup %1726 }
 0x3df   :  { %v1114_v24 = vmul.f32 0.5, %v1727_v21  ;;  %1317 = vmatmul.mubr.f32.vlgmr.msra.gmra.mxu1 %v2637_v50  ;;  %v1161_v30 = vmul.f32 %v1145_v37, %v1129_v54 }
 0x3e0   :  { %1322 = vmatprep.mubr.f32.mxu1 %v2758_v47 }
 0x3e1   :  { %v1130_v10 = vadd.f32 0.5, %v1114_v24  ;;  %v2644_v5 = vadd.f32 %v1161_v30, %v2517_v12 }
 0x3e2   :  { %v1729_v35 = vpop.eup %1728 }
 0x3e3   :  { %v1115_v40 = vmul.f32 0.5, %v1729_v35  ;;  %1323 = vmatmul.mubr.f32.gmra.mxu1 %v2644_v5  ;;  %v1162_v17 = vmul.f32 %v1146_v4, %v1130_v10 }
 0x3e4   :  { %1328 = vmatprep.mubr.f32.mxu1 %v2758_v47 }
 0x3e5   :  { %v1131_v63 = vadd.f32 0.5, %v1115_v40  ;;  %v2650_v2 = vadd.f32 %v1162_v17, %v2523_v44 }
 0x3e7   :  { %1329 = vmatmul.mubr.f32.gmra.mxu1 %v2650_v2  ;;  %v1163_v26 = vmul.f32 %v1147_v19, %v1131_v63 }
 0x3e8   :  { %1334 = vmatprep.mubr.f32.mxu1 %v2758_v47 }
 0x3e9   :  { %v2655_v12 = vadd.f32 %v1163_v26, %v2528_v52 }
 0x3eb   :  { %1335 = vmatmul.mubr.f32.gmra.mxu1 %v2655_v12 }
 0x46f   :  { %v1246_v3 = vpop.f32.mrf.mxu0 }
 0x470   :  { %v1247_v52 = vadd.f32 %v1246_v3, %v2197_v51 }
 0x471   :  { %v1248_v18 = vpop.f32.mrf.mxu0 }
 0x472   :  { %v1249_v61 = vadd.f32 %v1248_v18, %v2193_v57  ;;  %v1341_v43 = vmax.f32 %v1247_v52, 0.0 }
 0x473   :  { %v1252_v60 = vpop.f32.mrf.mxu0 }
 0x474   :  { %v1357_v13 = vmul.f32 0.5, %v1249_v61  ;;  %v1253_v25 = vadd.f32 %v1252_v60, %v2197_v51  ;;  %v1421_v56 = vsub.f32 %v1341_v43, %v2543_v41 }
 0x475   :  { %v1254_v22 = vpop.f32.mrf.mxu0 }
 0x476   :  { %1730 = vtanh.f32 %v1357_v13  ;;  %v1255_v44 = vadd.f32 %v1254_v22, %v2193_v57  ;;  %v1342_v54 = vmax.f32 %v1253_v25, 0.0 }
 0x477   :  { %v1258_v48 = vpop.f32.mrf.mxu0 }
 0x478   :  { %v1358_v11 = vmul.f32 0.5, %v1255_v44  ;;  %v1259_v29 = vadd.f32 %v1258_v48, %v2197_v51  ;;  %v1422_v40 = vsub.f32 %v1342_v54, %v2554_v27 }
 0x479   :  { %v1260_v46 = vpop.f32.mrf.mxu0 }
 0x47a   :  { %1732 = vtanh.f32 %v1358_v11  ;;  %v1261_v47 = vadd.f32 %v1260_v46, %v2193_v57  ;;  %v1343_v10 = vmax.f32 %v1259_v29, 0.0 }
 0x47b   :  { %v1264_v9 = vpop.f32.mrf.mxu0 }
 0x47c   :  { %v1359_v15 = vmul.f32 0.5, %v1261_v47  ;;  %v1265_v49 = vadd.f32 %v1264_v9, %v2197_v51 }
 0x47d   :  { %v1266_v55 = vpop.f32.mrf.mxu0 }
 0x47e   :  { %1734 = vtanh.f32 %v1359_v15  ;;  %v1267_v39 = vadd.f32 %v1266_v55, %v2193_v57  ;;  %v1344_v13 = vmax.f32 %v1265_v49, 0.0 }
 0x47f   :  { %v1270_v7 = vpop.f32.mrf.mxu0 }
 0x480   :  { %v1360_v34 = vmul.f32 0.5, %v1267_v39  ;;  %v1271_v60 = vadd.f32 %v1270_v7, %v2197_v51  ;;  %v1424_v55 = vsub.f32 %v1344_v13, %v2570_v58 }
 0x481   :  { %v1272_v23 = vpop.f32.mrf.mxu0 }
 0x482   :  { %1736 = vtanh.f32 %v1360_v34  ;;  %v1273_v6 = vadd.f32 %v1272_v23, %v2193_v57  ;;  %v1345_v34 = vmax.f32 %v1271_v60, 0.0 }
 0x483   :  { %v1731_v36 = vpop.eup %1730  ;;  %v1276_v0 = vpop.f32.mrf.mxu0 }
 0x484   :  { %v1389_v28 = vmul.f32 0.5, %v1731_v36  ;;  %v1361_v1 = vmul.f32 0.5, %v1273_v6  ;;  %v1277_v39 = vadd.f32 %v1276_v0, %v2197_v51  ;;  %v1425_v29 = vsub.f32 %v1345_v34, %v2578_v8 }
 0x485   :  { %v1278_v37 = vpop.f32.mrf.mxu0 }
 0x486   :  { %v1405_v32 = vadd.f32 0.5, %v1389_v28  ;;  %1738 = vtanh.f32 %v1361_v1  ;;  %v1279_v53 = vadd.f32 %v1278_v37, %v2193_v57 }
 0x487   :  { %v1733_v38 = vpop.eup %1732  ;;  %v1282_v24 = vpop.f32.mrf.mxu0 }
 0x488   :  { %v1437_v14 = vmul.f32 %v1421_v56, %v1405_v32  ;;  %v1390_v30 = vmul.f32 0.5, %v1733_v38  ;;  %v1362_v4 = vmul.f32 0.5, %v1279_v53  ;;  %v1346_v56 = vmax.f32 %v1277_v39, 0.0 }
 0x489   :  { %v1284_v35 = vpop.f32.mrf.mxu0  ;;  %v1283_v32 = vadd.f32 %v1282_v24, %v2197_v51 }
 0x48a   :  { %v1453_v21 = vadd.f32 %v1437_v14, %v2543_v41  ;;  %v1406_v17 = vadd.f32 0.5, %v1390_v30  ;;  %1740 = vtanh.f32 %v1362_v4  ;;  %v1285_v19 = vadd.f32 %v1284_v35, %v2193_v57 }
 0x48b   :  { %v1735_v63 = vpop.eup %1734  ;;  %v1288_v26 = vpop.f32.mrf.mxu0  ;;  %v1423_v41 = vsub.f32 %v1343_v10, %v2562_v31  ;;  %v1426_v4 = vsub.f32 %v1346_v56, %v2586_v62  ;;  %v1347_v10 = vmax.f32 %v1283_v32, 0.0 }
 0x48c   :  { %1469 = vst [vmem:[#allocation10] sm:$0xff] %v1453_v21  ;;  %v1438_v3 = vmul.f32 %v1422_v40, %v1406_v17  ;;  %v1391_v18 = vmul.f32 0.5, %v1735_v63  ;;  %v1363_v61 = vmul.f32 0.5, %v1285_v19  ;;  %v1289_v24 = vadd.f32 %v1288_v26, %v2197_v51 }
 0x48d   :  { %v1290_v22 = vpop.f32.mrf.mxu0 }
 0x48e   :  { %v1454_v44 = vadd.f32 %v1438_v3, %v2554_v27  ;;  %v1407_v48 = vadd.f32 0.5, %v1391_v18  ;;  %1742 = vtanh.f32 %v1363_v61  ;;  %v1291_v11 = vadd.f32 %v1290_v22, %v2193_v57 }
 0x48f   :  { %v1737_v46 = vpop.eup %1736  ;;  %v1294_v47 = vpop.f32.mrf.mxu0  ;;  %v1427_v61 = vsub.f32 %v1347_v10, %v2594_v42  ;;  %v1348_v26 = vmax.f32 %v1289_v24, 0.0 }
 0x490   :  { %1470 = vst [vmem:[#allocation10 + $0x8] sm:$0xff] %v1454_v44  ;;  %v1439_v52 = vmul.f32 %v1423_v41, %v1407_v48  ;;  %v1392_v9 = vmul.f32 0.5, %v1737_v46  ;;  %v1364_v15 = vmul.f32 0.5, %v1291_v11  ;;  %v1295_v44 = vadd.f32 %v1294_v47, %v2197_v51 }
 0x491   :  { %v1296_v43 = vpop.f32.mrf.mxu0 }
 0x492   :  { %v1455_v7 = vadd.f32 %v1439_v52, %v2562_v31  ;;  %v1408_v36 = vadd.f32 0.5, %v1392_v9  ;;  %1744 = vtanh.f32 %v1364_v15  ;;  %v1297_v28 = vadd.f32 %v1296_v43, %v2193_v57 }
 0x493   :  { %v1739_v27 = vpop.eup %1738  ;;  %v1300_v23 = vpop.f32.mrf.mxu0 }
 0x494   :  { %1471 = vst [vmem:[#allocation10 + $0x10] sm:$0xff] %v1455_v7  ;;  %v1440_v25 = vmul.f32 %v1424_v55, %v1408_v36  ;;  %v1393_v6 = vmul.f32 0.5, %v1739_v27  ;;  %v1365_v1 = vmul.f32 0.5, %v1297_v28  ;;  %v1301_v43 = vadd.f32 %v1300_v23, %v2197_v51 }
 0x495   :  { %v1302_v14 = vpop.f32.mrf.mxu0  ;;  %v1349_v36 = vmax.f32 %v1295_v44, 0.0 }
 0x496   :  { %v1456_v0 = vadd.f32 %v1440_v25, %v2570_v58  ;;  %v1409_v31 = vadd.f32 0.5, %v1393_v6  ;;  %v1303_v37 = vadd.f32 %v1302_v14, %v2193_v57  ;;  %1746 = vtanh.f32 %v1365_v1 }
 0x497   :  { %v1741_v54 = vpop.eup %1740  ;;  %v1306_v53 = vpop.f32.mrf.mxu0  ;;  %v1429_v23 = vsub.f32 %v1349_v36, %v2610_v59 }
 0x498   :  { %1472 = vst [vmem:[#allocation10 + $0x18] sm:$0xff] %v1456_v0  ;;  %v1441_v38 = vmul.f32 %v1425_v29, %v1409_v31  ;;  %v1394_v21 = vmul.f32 0.5, %v1741_v54  ;;  %v1366_v30 = vmul.f32 0.5, %v1303_v37  ;;  %v1307_v32 = vadd.f32 %v1306_v53, %v2197_v51 }
 0x499   :  { %v1308_v49 = vpop.f32.mrf.mxu0 }
 0x49a   :  { %v1457_v58 = vadd.f32 %v1441_v38, %v2578_v8  ;;  %v1410_v35 = vadd.f32 0.5, %v1394_v21  ;;  %1748 = vtanh.f32 %v1366_v30  ;;  %v1309_v40 = vadd.f32 %v1308_v49, %v2193_v57 }
 0x49b   :  { %v1743_v17 = vpop.eup %1742  ;;  %v1312_v19 = vpop.f32.mrf.mxu0 }
 0x49c   :  { %1473 = vst [vmem:[#allocation10 + $0x20] sm:$0xff] %v1457_v58  ;;  %v1442_v63 = vmul.f32 %v1426_v4, %v1410_v35  ;;  %v1395_v3 = vmul.f32 0.5, %v1743_v17  ;;  %v1367_v18 = vmul.f32 0.5, %v1309_v40  ;;  %v1313_v24 = vadd.f32 %v1312_v19, %v2197_v51 }
 0x49d   :  { %v1314_v41 = vpop.f32.mrf.mxu0 }
 0x49e   :  { %v1458_v13 = vadd.f32 %v1442_v63, %v2586_v62  ;;  %v1411_v60 = vadd.f32 0.5, %v1395_v3  ;;  %1750 = vtanh.f32 %v1367_v18  ;;  %v1315_v48 = vadd.f32 %v1314_v41, %v2193_v57 }
 0x49f   :  { %v1318_v22 = vpop.f32.mrf.mxu1  ;;  %v1745_v8 = vpop.eup %1744  ;;  %v1428_v62 = vsub.f32 %v1348_v26, %v2602_v16  ;;  %v1352_v41 = vmax.f32 %v1313_v24, 0.0 }
 0x4a0   :  { %1474 = vst [vmem:[#allocation10 + $0x28] sm:$0xff] %v1458_v13  ;;  %v1443_v11 = vmul.f32 %v1427_v61, %v1411_v60  ;;  %v1396_v46 = vmul.f32 0.5, %v1745_v8  ;;  %v1368_v9 = vmul.f32 0.5, %v1315_v48  ;;  %v1319_v17 = vadd.f32 %v1318_v22, %v2197_v51 }
 0x4a1   :  { %v1320_v52 = vpop.f32.mrf.mxu1 }
 0x4a2   :  { %v1321_v15 = vadd.f32 %v1320_v52, %v2193_v57  ;;  %v1459_v55 = vadd.f32 %v1443_v11, %v2594_v42  ;;  %v1412_v39 = vadd.f32 0.5, %v1396_v46  ;;  %1752 = vtanh.f32 %v1368_v9 }
 0x4a3   :  { %v1324_v7 = vpop.f32.mrf.mxu1  ;;  %v1747_v34 = vpop.eup %1746  ;;  %v1350_v42 = vmax.f32 %v1301_v43, 0.0  ;;  %v1353_v8 = vmax.f32 %v1319_v17, 0.0 }
 0x4a4   :  { %v1369_v47 = vmul.f32 0.5, %v1321_v15  ;;  %1475 = vst [vmem:[#allocation10 + $0x30] sm:$0xff] %v1459_v55  ;;  %v1444_v27 = vmul.f32 %v1428_v62, %v1412_v39  ;;  %v1397_v25 = vmul.f32 0.5, %v1747_v34  ;;  %v1325_v60 = vadd.f32 %v1324_v7, %v2197_v51 }
 0x4a5   :  { %v1326_v28 = vpop.f32.mrf.mxu1  ;;  %v1430_v21 = vsub.f32 %v1350_v42, %v2618_v45  ;;  %v1433_v52 = vsub.f32 %v1353_v8, %v2637_v50 }
 0x4a6   :  { %1754 = vtanh.f32 %v1369_v47  ;;  %v1327_v6 = vadd.f32 %v1326_v28, %v2193_v57  ;;  %v1460_v56 = vadd.f32 %v1444_v27, %v2602_v16  ;;  %v1413_v0 = vadd.f32 0.5, %v1397_v25 }
 0x4a7   :  { %v1330_v1 = vpop.f32.mrf.mxu1  ;;  %v1749_v14 = vpop.eup %1748  ;;  %v1351_v16 = vmax.f32 %v1307_v32, 0.0  ;;  %v1354_v11 = vmax.f32 %v1325_v60, 0.0 }
 0x4a8   :  { %v1370_v29 = vmul.f32 0.5, %v1327_v6  ;;  %1476 = vst [vmem:[#allocation10 + $0x38] sm:$0xff] %v1460_v56  ;;  %v1398_v31 = vmul.f32 0.5, %v1749_v14  ;;  %v1445_v54 = vmul.f32 %v1429_v23, %v1413_v0  ;;  %v1331_v15 = vadd.f32 %v1330_v1, %v2197_v51 }
 0x4a9   :  { %v1332_v37 = vpop.f32.mrf.mxu1  ;;  %v1431_v18 = vsub.f32 %v1351_v16, %v2625_v20  ;;  %v1434_v7 = vsub.f32 %v1354_v11, %v2644_v5 }
 0x4aa   :  { %1756 = vtanh.f32 %v1370_v29  ;;  %v1333_v38 = vadd.f32 %v1332_v37, %v2193_v57  ;;  %v1414_v30 = vadd.f32 0.5, %v1398_v31  ;;  %v1461_v53 = vadd.f32 %v1445_v54, %v2610_v59 }
 0x4ab   :  { %v1336_v4 = vpop.f32.mrf.mxu1  ;;  %v1751_v10 = vpop.eup %1750  ;;  %v1355_v47 = vmax.f32 %v1331_v15, 0.0 }
 0x4ac   :  { %v1371_v49 = vmul.f32 0.5, %v1333_v38  ;;  %v1446_v58 = vmul.f32 %v1430_v21, %v1414_v30  ;;  %v1399_v35 = vmul.f32 0.5, %v1751_v10  ;;  %1477 = vst [vmem:[#allocation10 + $0x40] sm:$0xff] %v1461_v53  ;;  %v1337_v34 = vadd.f32 %v1336_v4, %v2197_v51 }
 0x4ad   :  { %v1338_v40 = vpop.f32.mrf.mxu1  ;;  %v1435_v56 = vsub.f32 %v1355_v47, %v2650_v2 }
 0x4ae   :  { %1758 = vtanh.f32 %v1371_v49  ;;  %v1339_v63 = vadd.f32 %v1338_v40, %v2193_v57  ;;  %v1462_v3 = vadd.f32 %v1446_v58, %v2618_v45  ;;  %v1415_v61 = vadd.f32 0.5, %v1399_v35 }
 0x4af   :  { %v1753_v59 = vpop.eup %1752  ;;  %v1432_v57 = vsub.f32 %v1352_v41, %v2632_v33  ;;  %v1356_v42 = vmax.f32 %v1337_v34, 0.0 }
 0x4b0   :  { %v1372_v13 = vmul.f32 0.5, %v1339_v63  ;;  %1478 = vst [vmem:[#allocation10 + $0x48] sm:$0xff] %v1462_v3  ;;  %v1447_v19 = vmul.f32 %v1431_v18, %v1415_v61  ;;  %v1400_v26 = vmul.f32 0.5, %v1753_v59 }
 0x4b1   :  { %v1436_v23 = vsub.f32 %v1356_v42, %v2655_v12 }
 0x4b2   :  { %1760 = vtanh.f32 %v1372_v13  ;;  %v1463_v22 = vadd.f32 %v1447_v19, %v2625_v20  ;;  %v1416_v48 = vadd.f32 0.5, %v1400_v26 }
 0x4b3   :  { %v1755_v44 = vpop.eup %1754 }
 0x4b4   :  { %v1401_v45 = vmul.f32 0.5, %v1755_v44  ;;  %1479 = vst [vmem:[#allocation10 + $0x50] sm:$0xff] %v1463_v22  ;;  %v1448_v46 = vmul.f32 %v1432_v57, %v1416_v48 }
 0x4b6   :  { %v1417_v9 = vadd.f32 0.5, %v1401_v45  ;;  %v1464_v62 = vadd.f32 %v1448_v46, %v2632_v33 }
 0x4b7   :  { %v1757_v55 = vpop.eup %1756 }
 0x4b8   :  { %v1449_v39 = vmul.f32 %v1433_v52, %v1417_v9  ;;  %v1402_v43 = vmul.f32 0.5, %v1757_v55  ;;  %1480 = vst [vmem:[#allocation10 + $0x58] sm:$0xff] %v1464_v62 }
 0x4ba   :  { %v1465_v20 = vadd.f32 %v1449_v39, %v2637_v50  ;;  %v1418_v36 = vadd.f32 0.5, %v1402_v43 }
 0x4bb   :  { %v1759_v27 = vpop.eup %1758 }
 0x4bc   :  { %1481 = vst [vmem:[#allocation10 + $0x60] sm:$0xff] %v1465_v20  ;;  %v1450_v28 = vmul.f32 %v1434_v7, %v1418_v36  ;;  %v1403_v25 = vmul.f32 0.5, %v1759_v27 }
 0x4be   :  { %v1466_v6 = vadd.f32 %v1450_v28, %v2644_v5  ;;  %v1419_v33 = vadd.f32 0.5, %v1403_v25 }
 0x4bf   :  { %v1761_v32 = vpop.eup %1760 }
 0x4c0   :  { %1482 = vst [vmem:[#allocation10 + $0x68] sm:$0xff] %v1466_v6  ;;  %v1451_v1 = vmul.f32 %v1435_v56, %v1419_v33  ;;  %v1404_v14 = vmul.f32 0.5, %v1761_v32 }
 0x4c2   :  { %v1467_v50 = vadd.f32 %v1451_v1, %v2650_v2  ;;  %v1420_v0 = vadd.f32 0.5, %v1404_v14 }
 0x4c4   :  { %1483 = vst [vmem:[#allocation10 + $0x70] sm:$0xff] %v1467_v50  ;;  %v1452_v51 = vmul.f32 %v1436_v23, %v1420_v0 }
 0x4c6   :  { %v1468_v29 = vadd.f32 %v1452_v51, %v2655_v12 }
 0x4c8   :  { %1484 = vst [vmem:[#allocation10 + $0x78] sm:$0xff] %v1468_v29 }
 0x4c9   :  { %1884 = shalt.err (!%p1881_p10)
}
 0x4ca   :  { %1496 = dma.vmem_to_hbm [thread:$0]  %s1491_s15, 2048, %s2733_s5, [#allocation4], %s1903_s23, %s1903_s23, %s1904_s24  }
 0x4cb   :  { %1899 = dma.done.wait [#allocation4], 2048  }
 0x4cc   :  { %1900 = vsyncadd [#allocation4], 4294965248 }
 0x4cd   :  { %1500 = vsyncpa [#allocation3], 1 }
 0x4ce   :  { %1501 = vsyncpa [#allocation6], 1 }
 0x4cf   :  { %1502 = vsyncpa [#allocation9], 1 }
 0x4d0   :  { %1503 = vsyncpa [#allocation4], 1 }

</bundles_post_ra>
